<compile_context>
chip_gen: v7x
topology: tpu7x:2x2x1
jax: 0.10.0
libtpu: 0.0.40
codegen_flags: <defaults>
</compile_context>

<pallas_src>
import functools
import math

import jax
import jax.numpy as jnp
from jax.experimental import pallas as pl
from jax.experimental.pallas import tpu as pltpu

_LOG_2PI = math.log(2.0 * math.pi)


def conv_out_dim(n):
    """Output spatial size of Conv2d(kernel=3, stride=2, padding=1)."""
    return (n + 2 - 3) // 2 + 1


def _round_up(x, m):
    return ((x + m - 1) // m) * m


def _const_index_map(nd, i):
    return (0,) * nd


# ----------------------------------------------------------------------------
# Fused forward kernel: one grid step == one batch tile
# ----------------------------------------------------------------------------
def _fused_kernel(obs_ref, eps_ref,
                  m1_ref, bf1_ref, m2_ref, bf2_ref, m3_ref, bf3_ref,
                  wpv1_ref, bpv1_ref, wp2_ref, bp2_ref, wv2_ref, bv2_ref,
                  wa_ref, ba_ref, log_std_ref,
                  out_ref):
    f32 = jnp.float32

    # encoder: three convs folded into dense matmuls (exact same linear map)
    x = obs_ref[...]                                                     # (Bt, H*W)
    h1 = jnp.maximum(
        jnp.dot(x, m1_ref[...], preferred_element_type=f32) + bf1_ref[...], 0.0)
    h2 = jnp.maximum(
        jnp.dot(h1, m2_ref[...], preferred_element_type=f32) + bf2_ref[...], 0.0)
    h3 = jnp.maximum(
        jnp.dot(h2, m3_ref[...], preferred_element_type=f32) + bf3_ref[...], 0.0)

    # fused policy/value first layer: (Bt, F) @ (F, 128)
    hpv = jnp.maximum(
        jnp.dot(h3, wpv1_ref[...], preferred_element_type=f32) + bpv1_ref[...], 0.0)
    hp = hpv[:, :64]
    hv = hpv[:, 64:]

    pol = jnp.dot(hp, wp2_ref[...], preferred_element_type=f32) + bp2_ref[...]
    # value projection: VPU multiply + lane reduction instead of an N=1 matmul
    val = jnp.sum(hv * wv2_ref[...], axis=-1, keepdims=True) + bv2_ref[...]  # (Bt, 1)

    mean = jnp.dot(pol, wa_ref[...], preferred_element_type=f32) + ba_ref[...]  # (Bt, A)
    log_std = log_std_ref[...]                                            # (1, A)
    eps = eps_ref[...]                                                    # (Bt, A)

    act = mean + jnp.exp(log_std) * eps
    # Normal.log_prob(actions) with actions = mean + std*eps  =>  (a-mean)/std = eps
    logp = jnp.sum(-0.5 * eps * eps - log_std - 0.5 * _LOG_2PI,
                   axis=-1, keepdims=True)                                # (Bt, 1)

    # lane-dense packed output slab: [0:A]=actions, [A]=value, [A+1]=log_prob
    a = act.shape[-1]
    pieces = [act, val, logp]
    rest = out_ref.shape[-1] - (a + 2)
    if rest > 0:
        pieces.append(jnp.zeros((act.shape[0], rest), f32))
    out_ref[...] = jnp.concatenate(pieces, axis=-1)


# ----------------------------------------------------------------------------
# Forward wrapper
# ----------------------------------------------------------------------------
def actor_critic_forward(packed, obs, eps):
    """obs: (B, H, W) float32; eps: (B, act_dim) standard-normal noise.

    Returns (actions (B, act_dim), value (B, 1), log_prob (B,)).
    """
    B, H, W = obs.shape
    A = packed["wa"].shape[1]
    HW = H * W

    # batch tile: up to 128 samples per grid step (M dimension of every matmul)
    B_TILE = min(128, _round_up(max(B, 1), 8))
    B_pad = _round_up(B, B_TILE)
    n_tiles = B_pad // B_TILE

    obs_flat = jnp.pad(obs.reshape(B, HW).astype(jnp.float32),
                       ((0, B_pad - B), (0, 0)))
    eps_p = jnp.pad(eps.astype(jnp.float32), ((0, B_pad - B), (0, 0)))

    OUT_W = max(128, _round_up(A + 2, 128))   # lane-dense packed output width

    weight_args = (
        packed["m1"], packed["bf1"], packed["m2"], packed["bf2"],
        packed["m3"], packed["bf3"], packed["wpv1"], packed["bpv1"],
        packed["wp2"], packed["bp2"], packed["wv2"], packed["bv2"],
        packed["wa"], packed["ba"], packed["log_std"],
    )

    in_specs = [
        pl.BlockSpec((B_TILE, HW), lambda i: (i, 0)),       # obs batch tile
        pl.BlockSpec((B_TILE, A), lambda i: (i, 0)),        # eps batch tile
    ] + [pl.BlockSpec(w.shape, functools.partial(_const_index_map, w.ndim))
         for w in weight_args]                              # grid-invariant weights

    out_specs = pl.BlockSpec((B_TILE, OUT_W), lambda i: (i, 0))
    out_shape = jax.ShapeDtypeStruct((B_pad, OUT_W), jnp.float32)

    packed_out = pl.pallas_call(
        _fused_kernel,
        out_shape=out_shape,
        grid=(n_tiles,),
        in_specs=in_specs,
        out_specs=out_specs,
        compiler_params=pltpu.CompilerParams(
            dimension_semantics=("parallel",),
            # weights (~2.3 MB) + double-buffered batch tiles << 32 MB
            vmem_limit_bytes=32 * 1024 * 1024),
    )(obs_flat, eps_p, *weight_args)

    actions = packed_out[:B, :A]
    value = packed_out[:B, A:A + 1]
    log_prob = packed_out[:B, A + 1]
    return actions, value, log_prob


# ----------------------------------------------------------------------------
# Parameter init (deterministic, kaiming_normal fan_in / relu, zero biases)
# ----------------------------------------------------------------------------
def init_params(key, H, W, act_dim, output_size=64):
    def kaiming(k, shape, fan_in):
        return jax.random.normal(k, shape, jnp.float32) * jnp.sqrt(2.0 / fan_in)

    ks = jax.random.split(key, 10)
    Ho3 = conv_out_dim(conv_out_dim(conv_out_dim(H)))
    Wo3 = conv_out_dim(conv_out_dim(conv_out_dim(W)))
    num_features = 16 * Ho3 * Wo3

    return {
        "conv1_w": kaiming(ks[0], (16, 1, 3, 3), 1 * 9),
        "conv1_b": jnp.zeros((16,), jnp.float32),
        "conv2_w": kaiming(ks[1], (16, 16, 3, 3), 16 * 9),
        "conv2_b": jnp.zeros((16,), jnp.float32),
        "conv3_w": kaiming(ks[2], (16, 16, 3, 3), 16 * 9),
        "conv3_b": jnp.zeros((16,), jnp.float32),
        # linear weights stored as (in, out); rows in PyTorch NCHW-flatten order
        "w_p1": kaiming(ks[3], (num_features, 64), num_features),
        "b_p1": jnp.zeros((64,), jnp.float32),
        "w_p2": kaiming(ks[4], (64, output_size), 64),
        "b_p2": jnp.zeros((output_size,), jnp.float32),
        "w_v1": kaiming(ks[5], (num_features, 64), num_features),
        "b_v1": jnp.zeros((64,), jnp.float32),
        "w_v2": kaiming(ks[6], (64, 1), 64),
        "b_v2": jnp.zeros((1,), jnp.float32),
        "w_a": kaiming(ks[7], (output_size, act_dim), output_size),
        "b_a": jnp.zeros((act_dim,), jnp.float32),
        "log_std": jnp.zeros((act_dim,), jnp.float32),
    }


# ----------------------------------------------------------------------------
# One-time weight repacking
# ----------------------------------------------------------------------------
def _conv_linear_nhwc(x, w):
    """Linear part of Conv2d(k=3, s=2, p=1): x (N,Hi,Wi,Ci), w (Co,Ci,3,3) -> (N,Ho,Wo,Co)."""
    N, Hi, Wi, Ci = x.shape
    Ho, Wo = conv_out_dim(Hi), conv_out_dim(Wi)
    xp = jnp.pad(x, ((0, 0), (1, 1), (1, 1), (0, 0)))
    cols = [xp[:, i:i + 2 * Ho:2, j:j + 2 * Wo:2, :]
            for i in range(3) for j in range(3)]
    patches = jnp.concatenate(cols, axis=-1).reshape(N * Ho * Wo, 9 * Ci)
    wf = jnp.transpose(w, (2, 3, 1, 0)).reshape(9 * Ci, -1)
    y = jnp.dot(patches, wf, precision=jax.lax.Precision.HIGHEST)
    return y.reshape(N, Ho, Wo, -1)


def _conv_as_dense(w, Hi, Wi, Ci):
    """Fold Conv2d(k=3,s=2,p=1) (incl. zero padding) into an exact dense matrix.

    Rows index the NHWC-flattened input (Hi,Wi,Ci); columns index the
    NHWC-flattened output (Ho,Wo,Co). Built by pushing a one-hot basis through
    the linear conv, so it is exactly the same linear map as the conv."""
    K = Hi * Wi * Ci
    basis = jnp.eye(K, dtype=jnp.float32).reshape(K, Hi, Wi, Ci)
    out = _conv_linear_nhwc(basis, w)
    return out.reshape(K, -1)


def pack_params(params, H, W):
    Ho1, Wo1 = conv_out_dim(H), conv_out_dim(W)
    Ho2, Wo2 = conv_out_dim(Ho1), conv_out_dim(Wo1)
    Ho3, Wo3 = conv_out_dim(Ho2), conv_out_dim(Wo2)
    C = 16

    def nhwc_rows(w):      # (C*Ho3*Wo3, out) NCHW-row order -> NHWC-row order
        out = w.shape[1]
        return (w.reshape(C, Ho3, Wo3, out)
                 .transpose(1, 2, 0, 3)
                 .reshape(C * Ho3 * Wo3, out))

    return {
        # conv layers folded into dense (F_in, F_out) matrices + tiled biases
        "m1": _conv_as_dense(params["conv1_w"], H, W, 1),                 # (H*W, 16*Ho1*Wo1)
        "bf1": jnp.tile(params["conv1_b"], Ho1 * Wo1).reshape(1, -1),
        "m2": _conv_as_dense(params["conv2_w"], Ho1, Wo1, C),             # (16*Ho1*Wo1, 16*Ho2*Wo2)
        "bf2": jnp.tile(params["conv2_b"], Ho2 * Wo2).reshape(1, -1),
        "m3": _conv_as_dense(params["conv3_w"], Ho2, Wo2, C),             # (16*Ho2*Wo2, 16*Ho3*Wo3)
        "bf3": jnp.tile(params["conv3_b"], Ho3 * Wo3).reshape(1, -1),
        # policy/value first layers fused; rows permuted NCHW-flatten -> NHWC-flatten
        "wpv1": jnp.concatenate([nhwc_rows(params["w_p1"]),
                                 nhwc_rows(params["w_v1"])], axis=1),     # (F, 128)
        "bpv1": jnp.concatenate([params["b_p1"], params["b_v1"]]).reshape(1, 128),
        "wp2": params["w_p2"],                                            # (64, out)
        "bp2": params["b_p2"].reshape(1, -1),
        "wv2": params["w_v2"].T,                                          # (1, 64)
        "bv2": params["b_v2"].reshape(1, 1),
        "wa": params["w_a"],                                              # (out, A)
        "ba": params["b_a"].reshape(1, -1),
        "log_std": params["log_std"].reshape(1, -1),
    }


# ----------------------------------------------------------------------------
# Pure-JAX reference (im2col conv + NCHW flatten) for a correctness cross-check
# ----------------------------------------------------------------------------
def _reference_forward(params, obs, eps):
    hi = jax.lax.Precision.HIGHEST

    def conv(x, w, b):
        y = _conv_linear_nhwc(x, w)
        return jnp.maximum(y + b, 0.0)

    B, H, W = obs.shape
    x = obs.reshape(B, H, W, 1)
    x = conv(x, params["conv1_w"], params["conv1_b"])
    x = conv(x, params["conv2_w"], params["conv2_b"])
    x = conv(x, params["conv3_w"], params["conv3_b"])
    feat = jnp.transpose(x, (0, 3, 1, 2)).reshape(B, -1)            # PyTorch NCHW flatten

    hp = jnp.maximum(jnp.dot(feat, params["w_p1"], precision=hi) + params["b_p1"], 0.0)
    pol = jnp.dot(hp, params["w_p2"], precision=hi) + params["b_p2"]
    hv = jnp.maximum(jnp.dot(feat, params["w_v1"], precision=hi) + params["b_v1"], 0.0)
    val = jnp.dot(hv, params["w_v2"], precision=hi) + params["b_v2"]
    mean = jnp.dot(pol, params["w_a"], precision=hi) + params["b_a"]
    act = mean + jnp.exp(params["log_std"]) * eps
    logp = jnp.sum(-0.5 * eps * eps - params["log_std"] - 0.5 * _LOG_2PI, axis=-1)
    return act, val, logp


if __name__ == "__main__":
    B, H, W = 2, 16, 16
    ACT_DIM = 2

    key = jax.random.PRNGKey(0)
    k_param, k_obs, k_eps = jax.random.split(key, 3)

    params = init_params(k_param, H, W, ACT_DIM, output_size=64)
    packed = pack_params(params, H, W)
    obs = jax.random.uniform(k_obs, (B, H, W), jnp.float32)
    eps = jax.random.normal(k_eps, (B, ACT_DIM), jnp.float32)   # dist.sample() noise

    fwd = jax.jit(actor_critic_forward)
    actions, value, log_prob = fwd(packed, obs, eps)
    jax.block_until_ready((actions, value, log_prob))

    assert actions.shape == (B, ACT_DIM)
    assert value.shape == (B, 1)
    assert log_prob.shape == (B,)

    ref_act, ref_val, ref_logp = jax.jit(_reference_forward)(params, obs, eps)
    assert bool(jnp.allclose(actions, ref_act, atol=2e-3, rtol=2e-3)), "actions mismatch"
    assert bool(jnp.allclose(value, ref_val, atol=2e-3, rtol=2e-3)), "value mismatch"
    assert bool(jnp.allclose(log_prob, ref_logp, atol=2e-3, rtol=2e-3)), "log_prob mismatch"

    print("KERNEL_OK")
</pallas_src>

<mosaic_0001>
module attributes {stable_mosaic.version = 11 : i64} {
  func.func @_fused_kernel(%arg0: i32, %arg1: memref<8x256xf32, #tpu.memory_space<vmem>>, %arg2: memref<8x2xf32, #tpu.memory_space<vmem>>, %arg3: memref<256x1024xf32, #tpu.memory_space<vmem>>, %arg4: memref<1x1024xf32, #tpu.memory_space<vmem>>, %arg5: memref<1024x256xf32, #tpu.memory_space<vmem>>, %arg6: memref<1x256xf32, #tpu.memory_space<vmem>>, %arg7: memref<256x64xf32, #tpu.memory_space<vmem>>, %arg8: memref<1x64xf32, #tpu.memory_space<vmem>>, %arg9: memref<64x128xf32, #tpu.memory_space<vmem>>, %arg10: memref<1x128xf32, #tpu.memory_space<vmem>>, %arg11: memref<64x64xf32, #tpu.memory_space<vmem>>, %arg12: memref<1x64xf32, #tpu.memory_space<vmem>>, %arg13: memref<1x64xf32, #tpu.memory_space<vmem>>, %arg14: memref<1x1xf32, #tpu.memory_space<vmem>>, %arg15: memref<64x2xf32, #tpu.memory_space<vmem>>, %arg16: memref<1x2xf32, #tpu.memory_space<vmem>>, %arg17: memref<1x2xf32, #tpu.memory_space<vmem>>, %arg18: memref<8x128xf32, #tpu.memory_space<vmem>>) attributes {dimension_semantics = [#tpu.dimension_semantics<parallel>], iteration_bounds = array<i64: 1>, scalar_prefetch = 0 : i64, scratch_operands = 0 : i64, tpu.core_type = #tpu.core_type<tc>, window_params = [{transform_indices = @transform_0, window_bounds = array<i64: 8, 256>}, {transform_indices = @transform_1, window_bounds = array<i64: 8, 2>}, {pipeline_mode = #tpu.pipeline_mode<synchronous>, transform_indices = @transform_2, window_bounds = array<i64: 256, 1024>}, {pipeline_mode = #tpu.pipeline_mode<synchronous>, transform_indices = @transform_3, window_bounds = array<i64: 1, 1024>}, {pipeline_mode = #tpu.pipeline_mode<synchronous>, transform_indices = @transform_4, window_bounds = array<i64: 1024, 256>}, {pipeline_mode = #tpu.pipeline_mode<synchronous>, transform_indices = @transform_5, window_bounds = array<i64: 1, 256>}, {pipeline_mode = #tpu.pipeline_mode<synchronous>, transform_indices = @transform_6, window_bounds = array<i64: 256, 64>}, {pipeline_mode = #tpu.pipeline_mode<synchronous>, transform_indices = @transform_7, window_bounds = array<i64: 1, 64>}, {pipeline_mode = #tpu.pipeline_mode<synchronous>, transform_indices = @transform_8, window_bounds = array<i64: 64, 128>}, {pipeline_mode = #tpu.pipeline_mode<synchronous>, transform_indices = @transform_9, window_bounds = array<i64: 1, 128>}, {pipeline_mode = #tpu.pipeline_mode<synchronous>, transform_indices = @transform_10, window_bounds = array<i64: 64, 64>}, {pipeline_mode = #tpu.pipeline_mode<synchronous>, transform_indices = @transform_11, window_bounds = array<i64: 1, 64>}, {pipeline_mode = #tpu.pipeline_mode<synchronous>, transform_indices = @transform_12, window_bounds = array<i64: 1, 64>}, {pipeline_mode = #tpu.pipeline_mode<synchronous>, transform_indices = @transform_13, window_bounds = array<i64: 1, 1>}, {pipeline_mode = #tpu.pipeline_mode<synchronous>, transform_indices = @transform_14, window_bounds = array<i64: 64, 2>}, {pipeline_mode = #tpu.pipeline_mode<synchronous>, transform_indices = @transform_15, window_bounds = array<i64: 1, 2>}, {pipeline_mode = #tpu.pipeline_mode<synchronous>, transform_indices = @transform_16, window_bounds = array<i64: 1, 2>}, {transform_indices = @transform_17, window_bounds = array<i64: 8, 128>}]} {
    %c0 = arith.constant 0 : index
    %c0_0 = arith.constant 0 : index
    %0 = vector.load %arg1[%c0, %c0_0] : memref<8x256xf32, #tpu.memory_space<vmem>>, vector<8x256xf32>
    %c0_1 = arith.constant 0 : index
    %c0_2 = arith.constant 0 : index
    %1 = vector.load %arg3[%c0_1, %c0_2] : memref<256x1024xf32, #tpu.memory_space<vmem>>, vector<256x1024xf32>
    %cst = arith.constant dense<0.000000e+00> : vector<8x1024xf32>
    %2 = tpu.matmul %0, %1, %cst {dimension_numbers = #tpu.dot_dimension_numbers<[1], [0], [0], [1], [0, 0, 1, 1], [], []>} : vector<8x256xf32>, vector<256x1024xf32>, vector<8x1024xf32> -> vector<8x1024xf32>
    %c0_3 = arith.constant 0 : index
    %c0_4 = arith.constant 0 : index
    %3 = vector.load %arg4[%c0_3, %c0_4] : memref<1x1024xf32, #tpu.memory_space<vmem>>, vector<1x1024xf32>
    %4 = vector.broadcast %3 : vector<1x1024xf32> to vector<8x1024xf32>
    %5 = arith.addf %2, %4 : vector<8x1024xf32>
    %cst_5 = arith.constant 0.000000e+00 : f32
    %6 = vector.broadcast %cst_5 : f32 to vector<8x1024xf32>
    %7 = arith.maximumf %5, %6 : vector<8x1024xf32>
    %c0_6 = arith.constant 0 : index
    %c0_7 = arith.constant 0 : index
    %8 = vector.load %arg5[%c0_6, %c0_7] : memref<1024x256xf32, #tpu.memory_space<vmem>>, vector<1024x256xf32>
    %cst_8 = arith.constant dense<0.000000e+00> : vector<8x256xf32>
    %9 = tpu.matmul %7, %8, %cst_8 {dimension_numbers = #tpu.dot_dimension_numbers<[1], [0], [0], [1], [0, 0, 1, 1], [], []>} : vector<8x1024xf32>, vector<1024x256xf32>, vector<8x256xf32> -> vector<8x256xf32>
    %c0_9 = arith.constant 0 : index
    %c0_10 = arith.constant 0 : index
    %10 = vector.load %arg6[%c0_9, %c0_10] : memref<1x256xf32, #tpu.memory_space<vmem>>, vector<1x256xf32>
    %11 = vector.broadcast %10 : vector<1x256xf32> to vector<8x256xf32>
    %12 = arith.addf %9, %11 : vector<8x256xf32>
    %cst_11 = arith.constant 0.000000e+00 : f32
    %13 = vector.broadcast %cst_11 : f32 to vector<8x256xf32>
    %14 = arith.maximumf %12, %13 : vector<8x256xf32>
    %c0_12 = arith.constant 0 : index
    %c0_13 = arith.constant 0 : index
    %15 = vector.load %arg7[%c0_12, %c0_13] : memref<256x64xf32, #tpu.memory_space<vmem>>, vector<256x64xf32>
    %cst_14 = arith.constant dense<0.000000e+00> : vector<8x64xf32>
    %16 = tpu.matmul %14, %15, %cst_14 {dimension_numbers = #tpu.dot_dimension_numbers<[1], [0], [0], [1], [0, 0, 1, 1], [], []>} : vector<8x256xf32>, vector<256x64xf32>, vector<8x64xf32> -> vector<8x64xf32>
    %c0_15 = arith.constant 0 : index
    %c0_16 = arith.constant 0 : index
    %17 = vector.load %arg8[%c0_15, %c0_16] : memref<1x64xf32, #tpu.memory_space<vmem>>, vector<1x64xf32>
    %18 = vector.broadcast %17 : vector<1x64xf32> to vector<8x64xf32>
    %19 = arith.addf %16, %18 : vector<8x64xf32>
    %cst_17 = arith.constant 0.000000e+00 : f32
    %20 = vector.broadcast %cst_17 : f32 to vector<8x64xf32>
    %21 = arith.maximumf %19, %20 : vector<8x64xf32>
    %c0_18 = arith.constant 0 : index
    %c0_19 = arith.constant 0 : index
    %22 = vector.load %arg9[%c0_18, %c0_19] : memref<64x128xf32, #tpu.memory_space<vmem>>, vector<64x128xf32>
    %cst_20 = arith.constant dense<0.000000e+00> : vector<8x128xf32>
    %23 = tpu.matmul %21, %22, %cst_20 {dimension_numbers = #tpu.dot_dimension_numbers<[1], [0], [0], [1], [0, 0, 1, 1], [], []>} : vector<8x64xf32>, vector<64x128xf32>, vector<8x128xf32> -> vector<8x128xf32>
    %c0_21 = arith.constant 0 : index
    %c0_22 = arith.constant 0 : index
    %24 = vector.load %arg10[%c0_21, %c0_22] : memref<1x128xf32, #tpu.memory_space<vmem>>, vector<1x128xf32>
    %25 = vector.broadcast %24 : vector<1x128xf32> to vector<8x128xf32>
    %26 = arith.addf %23, %25 : vector<8x128xf32>
    %cst_23 = arith.constant 0.000000e+00 : f32
    %27 = vector.broadcast %cst_23 : f32 to vector<8x128xf32>
    %28 = arith.maximumf %26, %27 : vector<8x128xf32>
    %29 = vector.extract_strided_slice %28 {offsets = [0, 0], sizes = [8, 64], strides = [1, 1]} : vector<8x128xf32> to vector<8x64xf32>
    %30 = vector.extract_strided_slice %28 {offsets = [0, 64], sizes = [8, 64], strides = [1, 1]} : vector<8x128xf32> to vector<8x64xf32>
    %c0_24 = arith.constant 0 : index
    %c0_25 = arith.constant 0 : index
    %31 = vector.load %arg11[%c0_24, %c0_25] : memref<64x64xf32, #tpu.memory_space<vmem>>, vector<64x64xf32>
    %cst_26 = arith.constant dense<0.000000e+00> : vector<8x64xf32>
    %32 = tpu.matmul %29, %31, %cst_26 {dimension_numbers = #tpu.dot_dimension_numbers<[1], [0], [0], [1], [0, 0, 1, 1], [], []>} : vector<8x64xf32>, vector<64x64xf32>, vector<8x64xf32> -> vector<8x64xf32>
    %c0_27 = arith.constant 0 : index
    %c0_28 = arith.constant 0 : index
    %33 = vector.load %arg12[%c0_27, %c0_28] : memref<1x64xf32, #tpu.memory_space<vmem>>, vector<1x64xf32>
    %34 = vector.broadcast %33 : vector<1x64xf32> to vector<8x64xf32>
    %35 = arith.addf %32, %34 : vector<8x64xf32>
    %c0_29 = arith.constant 0 : index
    %c0_30 = arith.constant 0 : index
    %36 = vector.load %arg13[%c0_29, %c0_30] : memref<1x64xf32, #tpu.memory_space<vmem>>, vector<1x64xf32>
    %37 = vector.broadcast %36 : vector<1x64xf32> to vector<8x64xf32>
    %38 = arith.mulf %30, %37 : vector<8x64xf32>
    %cst_31 = arith.constant dense<0.000000e+00> : vector<8xf32>
    %39 = vector.multi_reduction <add>, %38, %cst_31 [1] : vector<8x64xf32> to vector<8xf32>
    %40 = vector.shape_cast %39 : vector<8xf32> to vector<8x1xf32>
    %c0_32 = arith.constant 0 : index
    %c0_33 = arith.constant 0 : index
    %41 = vector.load %arg14[%c0_32, %c0_33] : memref<1x1xf32, #tpu.memory_space<vmem>>, vector<1x1xf32>
    %42 = vector.broadcast %41 : vector<1x1xf32> to vector<8x1xf32>
    %43 = arith.addf %40, %42 : vector<8x1xf32>
    %c0_34 = arith.constant 0 : index
    %c0_35 = arith.constant 0 : index
    %44 = vector.load %arg15[%c0_34, %c0_35] : memref<64x2xf32, #tpu.memory_space<vmem>>, vector<64x2xf32>
    %cst_36 = arith.constant dense<0.000000e+00> : vector<8x2xf32>
    %45 = tpu.matmul %35, %44, %cst_36 {dimension_numbers = #tpu.dot_dimension_numbers<[1], [0], [0], [1], [0, 0, 1, 1], [], []>} : vector<8x64xf32>, vector<64x2xf32>, vector<8x2xf32> -> vector<8x2xf32>
    %c0_37 = arith.constant 0 : index
    %c0_38 = arith.constant 0 : index
    %46 = vector.load %arg16[%c0_37, %c0_38] : memref<1x2xf32, #tpu.memory_space<vmem>>, vector<1x2xf32>
    %47 = vector.broadcast %46 : vector<1x2xf32> to vector<8x2xf32>
    %48 = arith.addf %45, %47 : vector<8x2xf32>
    %c0_39 = arith.constant 0 : index
    %c0_40 = arith.constant 0 : index
    %49 = vector.load %arg17[%c0_39, %c0_40] : memref<1x2xf32, #tpu.memory_space<vmem>>, vector<1x2xf32>
    %c0_41 = arith.constant 0 : index
    %c0_42 = arith.constant 0 : index
    %50 = vector.load %arg2[%c0_41, %c0_42] : memref<8x2xf32, #tpu.memory_space<vmem>>, vector<8x2xf32>
    %51 = math.exp %49 : vector<1x2xf32>
    %52 = vector.broadcast %51 : vector<1x2xf32> to vector<8x2xf32>
    %53 = arith.mulf %52, %50 : vector<8x2xf32>
    %54 = arith.addf %48, %53 : vector<8x2xf32>
    %cst_43 = arith.constant -5.000000e-01 : f32
    %55 = vector.broadcast %cst_43 : f32 to vector<8x2xf32>
    %56 = arith.mulf %55, %50 : vector<8x2xf32>
    %57 = arith.mulf %56, %50 : vector<8x2xf32>
    %58 = vector.broadcast %49 : vector<1x2xf32> to vector<8x2xf32>
    %59 = arith.subf %57, %58 : vector<8x2xf32>
    %cst_44 = arith.constant 0.918938517 : f32
    %60 = vector.broadcast %cst_44 : f32 to vector<8x2xf32>
    %61 = arith.subf %59, %60 : vector<8x2xf32>
    %cst_45 = arith.constant dense<0.000000e+00> : vector<8xf32>
    %62 = vector.multi_reduction <add>, %61, %cst_45 [1] : vector<8x2xf32> to vector<8xf32>
    %63 = vector.shape_cast %62 : vector<8xf32> to vector<8x1xf32>
    %cst_46 = arith.constant 0.000000e+00 : f32
    %64 = vector.broadcast %cst_46 : f32 to vector<8x124xf32>
    %65 = tpu.concatenate %54, %43, %63, %64 in 1 : vector<8x2xf32>, vector<8x1xf32>, vector<8x1xf32>, vector<8x124xf32> -> vector<8x128xf32>
    %c0_47 = arith.constant 0 : index
    %c0_48 = arith.constant 0 : index
    %66 = vector.load %arg18[%c0_47, %c0_48] : memref<8x128xf32, #tpu.memory_space<vmem>>, vector<8x128xf32>
    tpu.vector_store %arg18[%c0_47, %c0_48], %65 {strides = array<i32>} : memref<8x128xf32, #tpu.memory_space<vmem>>, vector<8x128xf32>,
    return
  }
  func.func @transform_0(%arg0: i32) -> (i32, i32) {
    %c0_i32 = arith.constant 0 : i32
    %c0_i32_0 = arith.constant 0 : i32
    return %arg0, %c0_i32 : i32, i32
  }
  func.func @transform_1(%arg0: i32) -> (i32, i32) {
    %c0_i32 = arith.constant 0 : i32
    %c0_i32_0 = arith.constant 0 : i32
    return %arg0, %c0_i32 : i32, i32
  }
  func.func @transform_2(%arg0: i32) -> (i32, i32) {
    %c0_i32 = arith.constant 0 : i32
    %c0_i32_0 = arith.constant 0 : i32
    %c0_i32_1 = arith.constant 0 : i32
    return %c0_i32, %c0_i32_0 : i32, i32
  }
  func.func @transform_3(%arg0: i32) -> (i32, i32) {
    %c0_i32 = arith.constant 0 : i32
    %c0_i32_0 = arith.constant 0 : i32
    %c0_i32_1 = arith.constant 0 : i32
    return %c0_i32, %c0_i32_0 : i32, i32
  }
  func.func @transform_4(%arg0: i32) -> (i32, i32) {
    %c0_i32 = arith.constant 0 : i32
    %c0_i32_0 = arith.constant 0 : i32
    %c0_i32_1 = arith.constant 0 : i32
    return %c0_i32, %c0_i32_0 : i32, i32
  }
  func.func @transform_5(%arg0: i32) -> (i32, i32) {
    %c0_i32 = arith.constant 0 : i32
    %c0_i32_0 = arith.constant 0 : i32
    %c0_i32_1 = arith.constant 0 : i32
    return %c0_i32, %c0_i32_0 : i32, i32
  }
  func.func @transform_6(%arg0: i32) -> (i32, i32) {
    %c0_i32 = arith.constant 0 : i32
    %c0_i32_0 = arith.constant 0 : i32
    %c0_i32_1 = arith.constant 0 : i32
    return %c0_i32, %c0_i32_0 : i32, i32
  }
  func.func @transform_7(%arg0: i32) -> (i32, i32) {
    %c0_i32 = arith.constant 0 : i32
    %c0_i32_0 = arith.constant 0 : i32
    %c0_i32_1 = arith.constant 0 : i32
    return %c0_i32, %c0_i32_0 : i32, i32
  }
  func.func @transform_8(%arg0: i32) -> (i32, i32) {
    %c0_i32 = arith.constant 0 : i32
    %c0_i32_0 = arith.constant 0 : i32
    %c0_i32_1 = arith.constant 0 : i32
    return %c0_i32, %c0_i32_0 : i32, i32
  }
  func.func @transform_9(%arg0: i32) -> (i32, i32) {
    %c0_i32 = arith.constant 0 : i32
    %c0_i32_0 = arith.constant 0 : i32
    %c0_i32_1 = arith.constant 0 : i32
    return %c0_i32, %c0_i32_0 : i32, i32
  }
  func.func @transform_10(%arg0: i32) -> (i32, i32) {
    %c0_i32 = arith.constant 0 : i32
    %c0_i32_0 = arith.constant 0 : i32
    %c0_i32_1 = arith.constant 0 : i32
    return %c0_i32, %c0_i32_0 : i32, i32
  }
  func.func @transform_11(%arg0: i32) -> (i32, i32) {
    %c0_i32 = arith.constant 0 : i32
    %c0_i32_0 = arith.constant 0 : i32
    %c0_i32_1 = arith.constant 0 : i32
    return %c0_i32, %c0_i32_0 : i32, i32
  }
  func.func @transform_12(%arg0: i32) -> (i32, i32) {
    %c0_i32 = arith.constant 0 : i32
    %c0_i32_0 = arith.constant 0 : i32
    %c0_i32_1 = arith.constant 0 : i32
    return %c0_i32, %c0_i32_0 : i32, i32
  }
  func.func @transform_13(%arg0: i32) -> (i32, i32) {
    %c0_i32 = arith.constant 0 : i32
    %c0_i32_0 = arith.constant 0 : i32
    %c0_i32_1 = arith.constant 0 : i32
    return %c0_i32, %c0_i32_0 : i32, i32
  }
  func.func @transform_14(%arg0: i32) -> (i32, i32) {
    %c0_i32 = arith.constant 0 : i32
    %c0_i32_0 = arith.constant 0 : i32
    %c0_i32_1 = arith.constant 0 : i32
    return %c0_i32, %c0_i32_0 : i32, i32
  }
  func.func @transform_15(%arg0: i32) -> (i32, i32) {
    %c0_i32 = arith.constant 0 : i32
    %c0_i32_0 = arith.constant 0 : i32
    %c0_i32_1 = arith.constant 0 : i32
    return %c0_i32, %c0_i32_0 : i32, i32
  }
  func.func @transform_16(%arg0: i32) -> (i32, i32) {
    %c0_i32 = arith.constant 0 : i32
    %c0_i32_0 = arith.constant 0 : i32
    %c0_i32_1 = arith.constant 0 : i32
    return %c0_i32, %c0_i32_0 : i32, i32
  }
  func.func @transform_17(%arg0: i32) -> (i32, i32) {
    %c0_i32 = arith.constant 0 : i32
    %c0_i32_0 = arith.constant 0 : i32
    return %arg0, %c0_i32 : i32, i32
  }
}

</mosaic_0001>

<bundles_post_ra>
// kernel: actor_critic_forward.1
= control target key start
LH: loop header
LB: loop body
LE: loop exit
PB: predicated region body
PF: predicated region fallthrough
CT: control target
= control target key end

     0   :  { %s2855_s0 = inlined_call_operand.vmem [shape: f32[8,256], index: 0, kind: input, shape index: {}]   ;;  %s2856_s1 = inlined_call_operand.vmem [shape: f32[8,2], index: 1, kind: input, shape index: {}]   ;;  %s2857_s2 = inlined_call_operand.hbm [shape: f32[256,1024], index: 2, kind: input, shape index: {}]   ;;  %s2858_s3 = inlined_call_operand.vmem [shape: f32[1,1024], index: 3, kind: input, shape index: {}]   ;;  %s2859_s4 = inlined_call_operand.hbm [shape: f32[1024,256], index: 4, kind: input, shape index: {}]   ;;  %s2860_s5 = inlined_call_operand.vmem [shape: f32[1,256], index: 5, kind: input, shape index: {}]   ;;  %s2861_s6 = inlined_call_operand.vmem [shape: f32[256,64], index: 6, kind: input, shape index: {}]   ;;  %s2862_s7 = inlined_call_operand.vmem [shape: f32[1,64], index: 7, kind: input, shape index: {}]   ;;  %s2863_s8 = inlined_call_operand.vmem [shape: f32[64,128], index: 8, kind: input, shape index: {}]   ;;  %s2864_s9 = inlined_call_operand.vmem [shape: f32[1,128], index: 9, kind: input, shape index: {}]   ;;  %s2865_s10 = inlined_call_operand.vmem [shape: f32[64,64], index: 10, kind: input, shape index: {}]   ;;  %s2866_s11 = inlined_call_operand.vmem [shape: f32[1,64], index: 11, kind: input, shape index: {}]   ;;  %s2867_s12 = inlined_call_operand.vmem [shape: f32[1,64], index: 12, kind: input, shape index: {}]   ;;  %s2868_s13 = inlined_call_operand.<no memory space> [shape: f32[1,1], index: 13, kind: input, shape index: {}]   ;;  %s2869_s14 = inlined_call_operand.vmem [shape: f32[64,2], index: 14, kind: input, shape index: {}]   ;;  %s2870_s15 = inlined_call_operand.vmem [shape: f32[1,2], index: 15, kind: input, shape index: {}]   ;;  %s2871_s16 = inlined_call_operand.vmem [shape: f32[1,2], index: 16, kind: input, shape index: {}]   ;;  %s2872_s17 = inlined_call_operand.vmem [shape: f32[8,128], index: 17, kind: output, shape index: {}]  }
   0x1   :  { %2874 = sst [smem:[#allocation9_spill]] %s2855_s0  ;;  %v22_v0 = vstv %s2868_s13 }
   0x2   :  { %2875 = sst [smem:[#allocation10_spill]] %s2856_s1  ;;  %23 = vst [vmem:[#allocation2] sm:$0x1] %v22_v0 }
   0x3   :  { %24 = vsyncpa [#allocation4], 0 }
   0x4   :  { %25 = vsyncpa [#allocation6], 0  ;;  %s2452_s26 = smov [#allocation3]   ;;  %s2404_s0 = scalar_lea.hbm %s2857_s2, 32768 }
   0x5   :  { %s35_s27 = sshll.u32 %s2452_s26, 4  ;;  %p2405_p0 = scmp.ne.s32.totalorder %s2857_s2, %s2404_s0  ;;  %s36_s27 = int_to_ptr.vmem [resolvable:$true] %s35_s27 }
   0x6   :  { %p2408_p1 = scmp.lt.u32.totalorder %s2404_s0, %s2857_s2 }
   0x8   :  { %p2410_p2 = pnand %p2408_p1, %p2405_p0 }
   0xa   :  { %2413 = shalt.err (!%p2410_p2)
}
   0xb   :  { %s2414_s13 = scalar_lea.vmem %s36_s27, 32768  ;;  %p2419_p4 = scmp.lt.s32.totalorder %s36_s27, %s36_s27 }
   0xc   :  { %p2415_p3 = scmp.ne.s32.totalorder %s36_s27, %s2414_s13  ;;  %p2420_p5 = scmp.lt.s32.totalorder %s2414_s13, %s2414_s13 }
   0xe   :  { %p2421_p6 = por %p2420_p5, %p2419_p4 }
  0x10   :  { %p2422_p7 = pnand %p2421_p6, %p2415_p3 }
  0x12   :  { %2425 = shalt.err (!%p2422_p7)
}
  0x13   :  { %s2453_s20 = smov 1024   ;;  %s2454_s21 = smov 64  }
  0x14   :  { %41 = dma.hbm_to_vmem [thread:$0]  %s2857_s2, 32768, %s36_s27, [#allocation4], %s2453_s20, %s2453_s20, %s2454_s21  }
  0x15   :  { %s2455_s24 = smov [#allocation5]   ;;  %s2426_s29 = scalar_lea.hbm %s2859_s4, 32768 }
  0x16   :  { %s49_s25 = sshll.u32 %s2455_s24, 4  ;;  %p2427_p8 = scmp.ne.s32.totalorder %s2859_s4, %s2426_s29  ;;  %s50_s25 = int_to_ptr.vmem [resolvable:$true] %s49_s25 }
  0x17   :  { %p2430_p9 = scmp.lt.u32.totalorder %s2426_s29, %s2859_s4 }
  0x19   :  { %p2432_p10 = pnand %p2430_p9, %p2427_p8 }
  0x1b   :  { %2435 = shalt.err (!%p2432_p10)
}
  0x1c   :  { %s2436_s1 = scalar_lea.vmem %s50_s25, 32768  ;;  %p2441_p12 = scmp.lt.s32.totalorder %s50_s25, %s50_s25 }
  0x1d   :  { %p2437_p11 = scmp.ne.s32.totalorder %s50_s25, %s2436_s1  ;;  %p2442_p13 = scmp.lt.s32.totalorder %s2436_s1, %s2436_s1 }
  0x1f   :  { %p2443_p0 = por %p2442_p13, %p2441_p12 }
  0x21   :  { %p2444_p1 = pnand %p2443_p0, %p2437_p11 }
  0x23   :  { %2447 = shalt.err (!%p2444_p1)
}
  0x24   :  { %s2456_s2 = smov 256   ;;  %s2457_s27 = smov 16  }
  0x25   :  { %55 = dma.hbm_to_vmem [thread:$0]  %s2859_s4, 32768, %s50_s25, [#allocation6], %s2456_s2, %s2456_s2, %s2457_s27  }
  0x26   :  { %2448 = dma.done.wait [#allocation4], 32768  }
  0x27   :  { %2449 = vsyncadd [#allocation4], 4294934528 }
  0x28   :  { %2450 = dma.done.wait [#allocation6], 32768  }
  0x29   :  { %2451 = vsyncadd [#allocation6], 4294934528  ;;  %v89_v1 = vld [vmem:[#allocation3 + $0x8] sm:$0xff]  ;;  %v88_v3 = vld [vmem:[#allocation3] sm:$0xff]  ;;  %s2876_s23 = sld [smem:[#allocation9_spill]]  ;;  %vm2459_vm0 = vmmov 0  }
  0x2a   :  { %v97_v2 = vld [vmem:[#allocation3 + $0x48] sm:$0xff]  ;;  %v96_v5 = vld [vmem:[#allocation3 + $0x40] sm:$0xff]  ;;  %vm1357_vm1 = vcmask 523264   ;;  %s2877_s29 = sld [smem:[#allocation10_spill]]  ;;  %vm1655_vm2 = vcmask 15360   ;;  %vm1664_vm3 = vcmask 23552  }
  0x2b   :  { %v1804_v4 = vpack.c.bf16 %v97_v2, %v89_v1  ;;  %v105_v6 = vld [vmem:[#allocation3 + $0x88] sm:$0xff]  ;;  %v1806_v8 = vpack.c.bf16 %v96_v5, %v88_v3  ;;  %v104_v10 = vld [vmem:[#allocation3 + $0x80] sm:$0xff]  ;;  %vm1666_vm4 = vcmask 31744  }
  0x2c   :  { %v113_v7 = vld [vmem:[#allocation3 + $0xc8] sm:$0xff]  ;;  %v112_v11 = vld [vmem:[#allocation3 + $0xc0] sm:$0xff] }
  0x2d   :  { %v1808_v9 = vpack.c.bf16 %v113_v7, %v105_v6  ;;  %v121_v12 = vld [vmem:[#allocation3 + $0x108] sm:$0xff]  ;;  %1805 = vmatprep.subr.bf16.mxu1 %v1804_v4  ;;  %v1810_v14 = vpack.c.bf16 %v112_v11, %v104_v10  ;;  %v120_v16 = vld [vmem:[#allocation3 + $0x100] sm:$0xff] }
  0x2e   :  { %v129_v13 = vld [vmem:[#allocation3 + $0x148] sm:$0xff]  ;;  %1807 = vmatpush1.bf16.msra.mxu1 %v1806_v8  ;;  %v128_v17 = vld [vmem:[#allocation3 + $0x140] sm:$0xff] }
  0x2f   :  { %1809 = vmatprep.subr.bf16.mxu1 %v1808_v9  ;;  %v1812_v15 = vpack.c.bf16 %v129_v13, %v121_v12  ;;  %v137_v18 = vld [vmem:[#allocation3 + $0x188] sm:$0xff]  ;;  %v1814_v20 = vpack.c.bf16 %v128_v17, %v120_v16  ;;  %v136_v22 = vld [vmem:[#allocation3 + $0x180] sm:$0xff] }
  0x30   :  { %v145_v19 = vld [vmem:[#allocation3 + $0x1c8] sm:$0xff]  ;;  %v144_v23 = vld [vmem:[#allocation3 + $0x1c0] sm:$0xff] }
  0x31   :  { %v1816_v21 = vpack.c.bf16 %v145_v19, %v137_v18  ;;  %v153_v24 = vld [vmem:[#allocation3 + $0x208] sm:$0xff]  ;;  %v1818_v26 = vpack.c.bf16 %v144_v23, %v136_v22  ;;  %v152_v28 = vld [vmem:[#allocation3 + $0x200] sm:$0xff] }
  0x32   :  { %1811 = vmatpush1.bf16.msra.mxu1 %v1810_v14  ;;  %v161_v25 = vld [vmem:[#allocation3 + $0x248] sm:$0xff]  ;;  %v160_v29 = vld [vmem:[#allocation3 + $0x240] sm:$0xff] }
  0x33   :  { %1813 = vmatprep.subr.bf16.mxu1 %v1812_v15  ;;  %v1820_v27 = vpack.c.bf16 %v161_v25, %v153_v24  ;;  %v169_v30 = vld [vmem:[#allocation3 + $0x288] sm:$0xff]  ;;  %v1822_v32 = vpack.c.bf16 %v160_v29, %v152_v28  ;;  %v168_v34 = vld [vmem:[#allocation3 + $0x280] sm:$0xff] }
  0x34   :  { %v177_v31 = vld [vmem:[#allocation3 + $0x2c8] sm:$0xff]  ;;  %v176_v35 = vld [vmem:[#allocation3 + $0x2c0] sm:$0xff] }
  0x35   :  { %v1824_v33 = vpack.c.bf16 %v177_v31, %v169_v30  ;;  %v185_v36 = vld [vmem:[#allocation3 + $0x308] sm:$0xff]  ;;  %v1826_v38 = vpack.c.bf16 %v176_v35, %v168_v34  ;;  %v184_v40 = vld [vmem:[#allocation3 + $0x300] sm:$0xff] }
  0x36   :  { %1815 = vmatpush1.bf16.msra.mxu1 %v1814_v20  ;;  %v193_v37 = vld [vmem:[#allocation3 + $0x348] sm:$0xff]  ;;  %v192_v41 = vld [vmem:[#allocation3 + $0x340] sm:$0xff] }
  0x37   :  { %1817 = vmatprep.subr.bf16.mxu1 %v1816_v21  ;;  %v1828_v39 = vpack.c.bf16 %v193_v37, %v185_v36  ;;  %v2583_v42 = vld [vmem:[%s2876_s23 + $0x8] sm:$0xff]  ;;  %v1830_v45 = vpack.c.bf16 %v192_v41, %v184_v40 }
  0x38   :  { %v201_v43 = vld [vmem:[#allocation3 + $0x388] sm:$0xff]  ;;  %450 = vmatprep.mubr.f32.mxu1 %v2583_v42  ;;  %592 = vmatprep.mubr.f32.mxu0 %v2583_v42  ;;  %v200_v47 = vld [vmem:[#allocation3 + $0x380] sm:$0xff] }
  0x39   :  { %v209_v44 = vld [vmem:[#allocation3 + $0x3c8] sm:$0xff]  ;;  %v208_v48 = vld [vmem:[#allocation3 + $0x3c0] sm:$0xff] }
  0x3a   :  { %1819 = vmatpush1.bf16.msra.mxu1 %v1818_v26  ;;  %v1832_v46 = vpack.c.bf16 %v209_v44, %v201_v43  ;;  %v217_v49 = vld [vmem:[#allocation3 + $0x408] sm:$0xff]  ;;  %v1834_v51 = vpack.c.bf16 %v208_v48, %v200_v47  ;;  %v216_v53 = vld [vmem:[#allocation3 + $0x400] sm:$0xff] }
  0x3b   :  { %1821 = vmatprep.subr.bf16.mxu1 %v1820_v27  ;;  %v225_v50 = vld [vmem:[#allocation3 + $0x448] sm:$0xff]  ;;  %v224_v54 = vld [vmem:[#allocation3 + $0x440] sm:$0xff] }
  0x3c   :  { %v1836_v52 = vpack.c.bf16 %v225_v50, %v217_v49  ;;  %v233_v55 = vld [vmem:[#allocation3 + $0x488] sm:$0xff]  ;;  %v1838_v57 = vpack.c.bf16 %v224_v54, %v216_v53  ;;  %v232_v59 = vld [vmem:[#allocation3 + $0x480] sm:$0xff] }
  0x3d   :  { %v241_v56 = vld [vmem:[#allocation3 + $0x4c8] sm:$0xff]  ;;  %v240_v60 = vld [vmem:[#allocation3 + $0x4c0] sm:$0xff] }
  0x3e   :  { %1823 = vmatpush1.bf16.msra.mxu1 %v1822_v32  ;;  %v1840_v58 = vpack.c.bf16 %v241_v56, %v233_v55  ;;  %v249_v61 = vld [vmem:[#allocation3 + $0x508] sm:$0xff]  ;;  %v1842_v63 = vpack.c.bf16 %v240_v60, %v232_v59  ;;  %v248_v1 = vld [vmem:[#allocation3 + $0x500] sm:$0xff] }
  0x3f   :  { %1825 = vmatprep.subr.bf16.mxu1 %v1824_v33  ;;  %v257_v62 = vld [vmem:[#allocation3 + $0x548] sm:$0xff]  ;;  %v256_v2 = vld [vmem:[#allocation3 + $0x540] sm:$0xff] }
  0x40   :  { %v1844_v0 = vpack.c.bf16 %v257_v62, %v249_v61  ;;  %v265_v3 = vld [vmem:[#allocation3 + $0x588] sm:$0xff]  ;;  %v1846_v5 = vpack.c.bf16 %v256_v2, %v248_v1  ;;  %v264_v7 = vld [vmem:[#allocation3 + $0x580] sm:$0xff]  ;;  %v91_v1 = vld [vmem:[#allocation3 + $0x18] sm:$0xff] }
  0x41   :  { %v273_v4 = vld [vmem:[#allocation3 + $0x5c8] sm:$0xff]  ;;  %v272_v8 = vld [vmem:[#allocation3 + $0x5c0] sm:$0xff]  ;;  %v99_v2 = vld [vmem:[#allocation3 + $0x58] sm:$0xff] }
  0x42   :  { %1827 = vmatpush1.bf16.msra.mxu1 %v1826_v38  ;;  %v1848_v6 = vpack.c.bf16 %v273_v4, %v265_v3  ;;  %v281_v9 = vld [vmem:[#allocation3 + $0x608] sm:$0xff]  ;;  %v280_v11 = vld [vmem:[#allocation3 + $0x600] sm:$0xff]  ;;  %v1850_v15 = vpack.c.bf16 %v272_v8, %v264_v7  ;;  %v1868_v8 = vpack.c.bf16 %v99_v2, %v91_v1 }
  0x43   :  { %1829 = vmatprep.subr.bf16.mxu1 %v1828_v39  ;;  %v289_v10 = vld [vmem:[#allocation3 + $0x648] sm:$0xff]  ;;  %v288_v12 = vld [vmem:[#allocation3 + $0x640] sm:$0xff] }
  0x44   :  { %v93_v13 = vld [vmem:[#allocation3 + $0x28] sm:$0xff]  ;;  %v92_v18 = vld [vmem:[#allocation3 + $0x20] sm:$0xff]  ;;  %v1852_v21 = vpack.c.bf16 %v289_v10, %v281_v9  ;;  %v1854_v31 = vpack.c.bf16 %v288_v12, %v280_v11  ;;  %v90_v9 = vld [vmem:[#allocation3 + $0x10] sm:$0xff] }
  0x45   :  { %v101_v14 = vld [vmem:[#allocation3 + $0x68] sm:$0xff]  ;;  %v100_v19 = vld [vmem:[#allocation3 + $0x60] sm:$0xff]  ;;  %v98_v10 = vld [vmem:[#allocation3 + $0x50] sm:$0xff] }
  0x46   :  { %1831 = vmatpush1.bf16.msra.mxu1 %v1830_v45  ;;  %v297_v16 = vld [vmem:[#allocation3 + $0x688] sm:$0xff]  ;;  %v1932_v17 = vpack.c.bf16 %v101_v14, %v93_v13  ;;  %v1934_v22 = vpack.c.bf16 %v100_v19, %v92_v18  ;;  %v108_v24 = vld [vmem:[#allocation3 + $0xa0] sm:$0xff]  ;;  %v107_v11 = vld [vmem:[#allocation3 + $0x98] sm:$0xff] }
  0x47   :  { %1833 = vmatprep.subr.bf16.mxu1 %v1832_v46  ;;  %v109_v20 = vld [vmem:[#allocation3 + $0xa8] sm:$0xff]  ;;  %v116_v25 = vld [vmem:[#allocation3 + $0xe0] sm:$0xff]  ;;  %v115_v12 = vld [vmem:[#allocation3 + $0xd8] sm:$0xff] }
  0x48   :  { %v117_v23 = vld [vmem:[#allocation3 + $0xe8] sm:$0xff]  ;;  %1933 = vmatprep.subr.bf16.mxu0 %v1932_v17  ;;  %v1938_v30 = vpack.c.bf16 %v116_v25, %v108_v24  ;;  %v296_v32 = vld [vmem:[#allocation3 + $0x680] sm:$0xff]  ;;  %v1870_v17 = vpack.c.bf16 %v98_v10, %v90_v9  ;;  %v106_v18 = vld [vmem:[#allocation3 + $0x90] sm:$0xff] }
  0x49   :  { %v305_v26 = vld [vmem:[#allocation3 + $0x6c8] sm:$0xff]  ;;  %v1936_v27 = vpack.c.bf16 %v117_v23, %v109_v20  ;;  %1935 = vmatpush1.bf16.msra.mxu0 %v1934_v22  ;;  %v124_v34 = vld [vmem:[#allocation3 + $0x120] sm:$0xff]  ;;  %v114_v22 = vld [vmem:[#allocation3 + $0xd0] sm:$0xff] }
  0x4a   :  { %1835 = vmatpush1.bf16.msra.mxu1 %v1834_v51  ;;  %v125_v28 = vld [vmem:[#allocation3 + $0x128] sm:$0xff]  ;;  %v132_v35 = vld [vmem:[#allocation3 + $0x160] sm:$0xff]  ;;  %v1856_v36 = vpack.c.bf16 %v305_v26, %v297_v16  ;;  %v123_v26 = vld [vmem:[#allocation3 + $0x118] sm:$0xff] }
  0x4b   :  { %1837 = vmatprep.subr.bf16.mxu1 %v1836_v52  ;;  %v133_v29 = vld [vmem:[#allocation3 + $0x168] sm:$0xff]  ;;  %1937 = vmatprep.subr.bf16.mxu0 %v1936_v27  ;;  %v304_v37 = vld [vmem:[#allocation3 + $0x6c0] sm:$0xff]  ;;  %v1942_v43 = vpack.c.bf16 %v132_v35, %v124_v34  ;;  %v131_v27 = vld [vmem:[#allocation3 + $0x158] sm:$0xff] }
  0x4c   :  { %v1940_v33 = vpack.c.bf16 %v133_v29, %v125_v28  ;;  %v141_v38 = vld [vmem:[#allocation3 + $0x1a8] sm:$0xff]  ;;  %v1858_v44 = vpack.c.bf16 %v304_v37, %v296_v32  ;;  %v312_v45 = vld [vmem:[#allocation3 + $0x700] sm:$0xff]  ;;  %v1874_v29 = vpack.c.bf16 %v114_v22, %v106_v18  ;;  %v1876_v34 = vpack.c.bf16 %v131_v27, %v123_v26  ;;  %v130_v35 = vld [vmem:[#allocation3 + $0x150] sm:$0xff] }
  0x4d   :  { %v149_v39 = vld [vmem:[#allocation3 + $0x1e8] sm:$0xff]  ;;  %1939 = vmatpush1.bf16.msra.mxu0 %v1938_v30  ;;  %v140_v47 = vld [vmem:[#allocation3 + $0x1a0] sm:$0xff]  ;;  %v122_v30 = vld [vmem:[#allocation3 + $0x110] sm:$0xff] }
  0x4e   :  { %1839 = vmatpush1.bf16.msra.mxu1 %v1838_v57  ;;  %v313_v40 = vld [vmem:[#allocation3 + $0x708] sm:$0xff]  ;;  %1941 = vmatprep.subr.bf16.mxu0 %v1940_v33  ;;  %v1944_v46 = vpack.c.bf16 %v149_v39, %v141_v38  ;;  %v148_v48 = vld [vmem:[#allocation3 + $0x1e0] sm:$0xff]  ;;  %v139_v38 = vld [vmem:[#allocation3 + $0x198] sm:$0xff] }
  0x4f   :  { %1841 = vmatprep.subr.bf16.mxu1 %v1840_v58  ;;  %v321_v41 = vld [vmem:[#allocation3 + $0x748] sm:$0xff]  ;;  %v320_v50 = vld [vmem:[#allocation3 + $0x740] sm:$0xff]  ;;  %v1946_v55 = vpack.c.bf16 %v148_v48, %v140_v47  ;;  %v147_v39 = vld [vmem:[#allocation3 + $0x1d8] sm:$0xff] }
  0x50   :  { %v1860_v49 = vpack.c.bf16 %v321_v41, %v313_v40  ;;  %v157_v51 = vld [vmem:[#allocation3 + $0x228] sm:$0xff]  ;;  %v1862_v56 = vpack.c.bf16 %v320_v50, %v312_v45  ;;  %v328_v57 = vld [vmem:[#allocation3 + $0x780] sm:$0xff]  ;;  %v1878_v41 = vpack.c.bf16 %v130_v35, %v122_v30  ;;  %v1880_v47 = vpack.c.bf16 %v147_v39, %v139_v38  ;;  %v146_v48 = vld [vmem:[#allocation3 + $0x1d0] sm:$0xff] }
  0x51   :  { %v165_v52 = vld [vmem:[#allocation3 + $0x268] sm:$0xff]  ;;  %1943 = vmatpush1.bf16.msra.mxu0 %v1942_v43  ;;  %v156_v59 = vld [vmem:[#allocation3 + $0x220] sm:$0xff]  ;;  %v138_v43 = vld [vmem:[#allocation3 + $0x190] sm:$0xff] }
  0x52   :  { %1843 = vmatpush1.bf16.msra.mxu1 %v1842_v63  ;;  %v329_v53 = vld [vmem:[#allocation3 + $0x788] sm:$0xff]  ;;  %1945 = vmatprep.subr.bf16.mxu0 %v1944_v46  ;;  %v1948_v58 = vpack.c.bf16 %v165_v52, %v157_v51  ;;  %v164_v60 = vld [vmem:[#allocation3 + $0x260] sm:$0xff]  ;;  %v155_v51 = vld [vmem:[#allocation3 + $0x218] sm:$0xff] }
  0x53   :  { %1845 = vmatprep.subr.bf16.mxu1 %v1844_v0  ;;  %v337_v54 = vld [vmem:[#allocation3 + $0x7c8] sm:$0xff]  ;;  %v336_v62 = vld [vmem:[#allocation3 + $0x7c0] sm:$0xff]  ;;  %v1950_v3 = vpack.c.bf16 %v164_v60, %v156_v59  ;;  %v163_v52 = vld [vmem:[#allocation3 + $0x258] sm:$0xff] }
  0x54   :  { %v1864_v61 = vpack.c.bf16 %v337_v54, %v329_v53  ;;  %v173_v63 = vld [vmem:[#allocation3 + $0x2a8] sm:$0xff]  ;;  %v1866_v4 = vpack.c.bf16 %v336_v62, %v328_v57  ;;  %v180_v7 = vld [vmem:[#allocation3 + $0x2e0] sm:$0xff]  ;;  %v1882_v54 = vpack.c.bf16 %v146_v48, %v138_v43  ;;  %v1884_v59 = vpack.c.bf16 %v163_v52, %v155_v51  ;;  %v162_v60 = vld [vmem:[#allocation3 + $0x250] sm:$0xff] }
  0x55   :  { %v181_v0 = vld [vmem:[#allocation3 + $0x2e8] sm:$0xff]  ;;  %1947 = vmatpush1.bf16.msra.mxu0 %v1946_v55  ;;  %v188_v19 = vld [vmem:[#allocation3 + $0x320] sm:$0xff]  ;;  %v154_v55 = vld [vmem:[#allocation3 + $0x210] sm:$0xff] }
  0x56   :  { %1847 = vmatpush1.bf16.msra.mxu1 %v1846_v5  ;;  %1949 = vmatprep.subr.bf16.mxu0 %v1948_v58  ;;  %v1952_v5 = vpack.c.bf16 %v181_v0, %v173_v63  ;;  %v189_v13 = vld [vmem:[#allocation3 + $0x328] sm:$0xff]  ;;  %v196_v20 = vld [vmem:[#allocation3 + $0x360] sm:$0xff]  ;;  %v171_v63 = vld [vmem:[#allocation3 + $0x298] sm:$0xff]  ;;  %v1886_v2 = vpack.c.bf16 %v162_v60, %v154_v55 }
  0x57   :  { %1849 = vmatprep.subr.bf16.mxu1 %v1848_v6  ;;  %v172_v6 = vld [vmem:[#allocation3 + $0x2a0] sm:$0xff]  ;;  %v197_v14 = vld [vmem:[#allocation3 + $0x368] sm:$0xff]  ;;  %v1958_v28 = vpack.c.bf16 %v196_v20, %v188_v19  ;;  %v179_v0 = vld [vmem:[#allocation3 + $0x2d8] sm:$0xff] }
  0x58   :  { %v1954_v16 = vpack.c.bf16 %v180_v7, %v172_v6  ;;  %v1956_v23 = vpack.c.bf16 %v197_v14, %v189_v13  ;;  %v205_v24 = vld [vmem:[#allocation3 + $0x3a8] sm:$0xff]  ;;  %v204_v32 = vld [vmem:[#allocation3 + $0x3a0] sm:$0xff]  ;;  %v1888_v7 = vpack.c.bf16 %v179_v0, %v171_v63 }
  0x59   :  { %1951 = vmatpush1.bf16.msra.mxu0 %v1950_v3  ;;  %v213_v25 = vld [vmem:[#allocation3 + $0x3e8] sm:$0xff]  ;;  %v212_v33 = vld [vmem:[#allocation3 + $0x3e0] sm:$0xff]  ;;  %v170_v3 = vld [vmem:[#allocation3 + $0x290] sm:$0xff] }
  0x5a   :  { %1851 = vmatpush1.bf16.msra.mxu1 %v1850_v15  ;;  %v2590_v15 = vld [vmem:[%s2876_s23] sm:$0xff]  ;;  %1953 = vmatprep.subr.bf16.mxu0 %v1952_v5  ;;  %v229_v37 = vld [vmem:[#allocation3 + $0x468] sm:$0xff]  ;;  %v1962_v40 = vpack.c.bf16 %v212_v33, %v204_v32  ;;  %v210_v33 = vld [vmem:[#allocation3 + $0x3d0] sm:$0xff] }
  0x5b   :  { %1853 = vmatprep.subr.bf16.mxu1 %v1852_v21  ;;  %v1872_v21 = vpack.c.bf16 %v115_v12, %v107_v11  ;;  %v220_v45 = vld [vmem:[#allocation3 + $0x420] sm:$0xff]  ;;  %v245_v50 = vld [vmem:[#allocation3 + $0x4e8] sm:$0xff]  ;;  %v187_v11 = vld [vmem:[#allocation3 + $0x318] sm:$0xff] }
  0x5c   :  { %v228_v46 = vld [vmem:[#allocation3 + $0x460] sm:$0xff]  ;;  %v261_v62 = vld [vmem:[#allocation3 + $0x568] sm:$0xff]  ;;  %v195_v12 = vld [vmem:[#allocation3 + $0x358] sm:$0xff] }
  0x5d   :  { %1955 = vmatpush1.bf16.msra.mxu0 %v1954_v16  ;;  %v1966_v53 = vpack.c.bf16 %v228_v46, %v220_v45  ;;  %v236_v57 = vld [vmem:[#allocation3 + $0x4a0] sm:$0xff]  ;;  %v269_v9 = vld [vmem:[#allocation3 + $0x5a8] sm:$0xff]  ;;  %v186_v16 = vld [vmem:[#allocation3 + $0x310] sm:$0xff]  ;;  %v1892_v20 = vpack.c.bf16 %v195_v12, %v187_v11 }
  0x5e   :  { %1855 = vmatpush1.bf16.msra.mxu1 %v1854_v31  ;;  %v1960_v31 = vpack.c.bf16 %v213_v25, %v205_v24  ;;  %1957 = vmatprep.subr.bf16.mxu0 %v1956_v23  ;;  %v244_v58 = vld [vmem:[#allocation3 + $0x4e0] sm:$0xff]  ;;  %v277_v10 = vld [vmem:[#allocation3 + $0x5e8] sm:$0xff]  ;;  %v203_v24 = vld [vmem:[#allocation3 + $0x398] sm:$0xff] }
  0x5f   :  { %1857 = vmatprep.subr.bf16.mxu1 %v1856_v36  ;;  %v221_v36 = vld [vmem:[#allocation3 + $0x428] sm:$0xff]  ;;  %v1970_v1 = vpack.c.bf16 %v244_v58, %v236_v57  ;;  %v252_v5 = vld [vmem:[#allocation3 + $0x520] sm:$0xff]  ;;  %v211_v25 = vld [vmem:[#allocation3 + $0x3d8] sm:$0xff] }
  0x60   :  { %v260_v6 = vld [vmem:[#allocation3 + $0x560] sm:$0xff]  ;;  %v285_v22 = vld [vmem:[#allocation3 + $0x628] sm:$0xff]  ;;  %v1896_v32 = vpack.c.bf16 %v211_v25, %v203_v24  ;;  %v226_v46 = vld [vmem:[#allocation3 + $0x450] sm:$0xff] }
  0x61   :  { %1959 = vmatpush1.bf16.msra.mxu0 %v1958_v28  ;;  %v1974_v13 = vpack.c.bf16 %v260_v6, %v252_v5  ;;  %v268_v18 = vld [vmem:[#allocation3 + $0x5a0] sm:$0xff]  ;;  %v293_v23 = vld [vmem:[#allocation3 + $0x668] sm:$0xff]  ;;  %v202_v28 = vld [vmem:[#allocation3 + $0x390] sm:$0xff] }
  0x62   :  { %1859 = vmatpush1.bf16.msra.mxu1 %v1858_v44  ;;  %1961 = vmatprep.subr.bf16.mxu0 %v1960_v31  ;;  %v1964_v44 = vpack.c.bf16 %v229_v37, %v221_v36  ;;  %v276_v19 = vld [vmem:[#allocation3 + $0x5e0] sm:$0xff]  ;;  %v309_v35 = vld [vmem:[#allocation3 + $0x6e8] sm:$0xff]  ;;  %v219_v36 = vld [vmem:[#allocation3 + $0x418] sm:$0xff]  ;;  %v1898_v39 = vpack.c.bf16 %v210_v33, %v202_v28 }
  0x63   :  { %1861 = vmatprep.subr.bf16.mxu1 %v1860_v49  ;;  %v237_v49 = vld [vmem:[#allocation3 + $0x4a8] sm:$0xff]  ;;  %v1978_v26 = vpack.c.bf16 %v276_v19, %v268_v18  ;;  %v284_v30 = vld [vmem:[#allocation3 + $0x620] sm:$0xff]  ;;  %v227_v37 = vld [vmem:[#allocation3 + $0x458] sm:$0xff] }
  0x64   :  { %v292_v31 = vld [vmem:[#allocation3 + $0x660] sm:$0xff]  ;;  %v1900_v45 = vpack.c.bf16 %v227_v37, %v219_v36  ;;  %v325_v48 = vld [vmem:[#allocation3 + $0x768] sm:$0xff]  ;;  %v242_v58 = vld [vmem:[#allocation3 + $0x4d0] sm:$0xff] }
  0x65   :  { %1963 = vmatpush1.bf16.msra.mxu0 %v1962_v40  ;;  %v1982_v38 = vpack.c.bf16 %v292_v31, %v284_v30  ;;  %v218_v40 = vld [vmem:[#allocation3 + $0x410] sm:$0xff]  ;;  %v300_v43 = vld [vmem:[#allocation3 + $0x6a0] sm:$0xff]  ;;  %v341_v60 = vld [vmem:[#allocation3 + $0x7e8] sm:$0xff] }
  0x66   :  { %1863 = vmatpush1.bf16.msra.mxu1 %v1862_v56  ;;  %1965 = vmatprep.subr.bf16.mxu0 %v1964_v44  ;;  %v1968_v56 = vpack.c.bf16 %v245_v50, %v237_v49  ;;  %v308_v44 = vld [vmem:[#allocation3 + $0x6e0] sm:$0xff]  ;;  %v235_v49 = vld [vmem:[#allocation3 + $0x498] sm:$0xff]  ;;  %v1902_v52 = vpack.c.bf16 %v226_v46, %v218_v40  ;;  %v258_v6 = vld [vmem:[#allocation3 + $0x550] sm:$0xff] }
  0x67   :  { %1865 = vmatprep.subr.bf16.mxu1 %v1864_v61  ;;  %v253_v61 = vld [vmem:[#allocation3 + $0x528] sm:$0xff]  ;;  %v243_v50 = vld [vmem:[#allocation3 + $0x4d8] sm:$0xff]  ;;  %v1986_v51 = vpack.c.bf16 %v308_v44, %v300_v43  ;;  %v316_v55 = vld [vmem:[#allocation3 + $0x720] sm:$0xff] }
  0x68   :  { %v1904_v57 = vpack.c.bf16 %v243_v50, %v235_v49  ;;  %v274_v19 = vld [vmem:[#allocation3 + $0x5d0] sm:$0xff]  ;;  %v682_v28 = vld [vmem:[#allocation5 + $0x20] sm:$0xff]  ;;  %v689_v33 = vld [vmem:[#allocation5 + $0x58] sm:$0xff] }
  0x69   :  { %1967 = vmatpush1.bf16.msra.mxu0 %v1966_v53  ;;  %v234_v53 = vld [vmem:[#allocation3 + $0x490] sm:$0xff]  ;;  %v686_v40 = vld [vmem:[#allocation5 + $0x40] sm:$0xff]  ;;  %v693_v46 = vld [vmem:[#allocation5 + $0x78] sm:$0xff] }
  0x6a   :  { %1867 = vmatpush1.bf16.msra.mxu1 %v1866_v4  ;;  %1969 = vmatprep.subr.bf16.mxu0 %v1968_v56  ;;  %v1972_v4 = vpack.c.bf16 %v261_v62, %v253_v61  ;;  %v324_v56 = vld [vmem:[#allocation3 + $0x760] sm:$0xff]  ;;  %v251_v61 = vld [vmem:[#allocation3 + $0x518] sm:$0xff]  ;;  %v1906_v0 = vpack.c.bf16 %v242_v58, %v234_v53  ;;  %v290_v31 = vld [vmem:[#allocation3 + $0x650] sm:$0xff] }
  0x6b   :  { %1869 = vmatprep.subr.bf16.mxu1 %v1868_v8  ;;  %v178_v8 = vld [vmem:[#allocation3 + $0x2d0] sm:$0xff]  ;;  %v259_v62 = vld [vmem:[#allocation3 + $0x558] sm:$0xff]  ;;  %v1990_v63 = vpack.c.bf16 %v324_v56, %v316_v55  ;;  %v690_v53 = vld [vmem:[#allocation5 + $0x60] sm:$0xff] }
  0x6c   :  { %v1890_v14 = vpack.c.bf16 %v178_v8, %v170_v3  ;;  %v332_v3 = vld [vmem:[#allocation3 + $0x7a0] sm:$0xff]  ;;  %v1908_v5 = vpack.c.bf16 %v259_v62, %v251_v61  ;;  %v681_v8 = vld [vmem:[#allocation5 + $0x18] sm:$0xff]  ;;  %v306_v44 = vld [vmem:[#allocation3 + $0x6d0] sm:$0xff] }
  0x6d   :  { %451 = vmatmul.mubr.f32.vlgmr.msra.gmra.mrb[0].mxu1 %v2590_v15  ;;  %1971 = vmatpush1.bf16.msra.mxu0 %v1970_v1  ;;  %v250_v1 = vld [vmem:[#allocation3 + $0x510] sm:$0xff]  ;;  %v697_v58 = vld [vmem:[#allocation5 + $0x98] sm:$0xff] }
  0x6e   :  { %1871 = vmatpush1.bf16.msra.mxu1 %v1870_v17  ;;  %521 = vmatprep.mubr.f32.mxu1 %v2583_v42  ;;  %v1976_v17 = vpack.c.bf16 %v277_v10, %v269_v9  ;;  %v267_v9 = vld [vmem:[#allocation3 + $0x598] sm:$0xff]  ;;  %v1910_v12 = vpack.c.bf16 %v258_v6, %v250_v1  ;;  %v322_v56 = vld [vmem:[#allocation3 + $0x750] sm:$0xff]  ;;  %v694_v1 = vld [vmem:[#allocation5 + $0x80] sm:$0xff] }
  0x6f   :  { %1873 = vmatprep.subr.bf16.mxu1 %v1872_v21  ;;  %1973 = vmatprep.subr.bf16.mxu0 %v1972_v4  ;;  %v194_v21 = vld [vmem:[#allocation3 + $0x350] sm:$0xff]  ;;  %v340_v4 = vld [vmem:[#allocation3 + $0x7e0] sm:$0xff]  ;;  %v275_v10 = vld [vmem:[#allocation3 + $0x5d8] sm:$0xff] }
  0x70   :  { %v1894_v27 = vpack.c.bf16 %v194_v21, %v186_v16  ;;  %v1994_v11 = vpack.c.bf16 %v340_v4, %v332_v3  ;;  %v678_v16 = vld [vmem:[#allocation5] sm:$0xff]  ;;  %v1912_v18 = vpack.c.bf16 %v275_v10, %v267_v9  ;;  %v685_v21 = vld [vmem:[#allocation5 + $0x38] sm:$0xff]  ;;  %v338_v4 = vld [vmem:[#allocation3 + $0x7d0] sm:$0xff] }
  0x71   :  { %1975 = vmatpush1.bf16.msra.mxu0 %v1974_v13  ;;  %v266_v13 = vld [vmem:[#allocation3 + $0x590] sm:$0xff]  ;;  %v701_v6 = vld [vmem:[#allocation5 + $0xb8] sm:$0xff] }
  0x72   :  { %1875 = vmatpush1.bf16.msra.mxu1 %v1874_v29  ;;  %1977 = vmatprep.subr.bf16.mxu0 %v1976_v17  ;;  %v1980_v29 = vpack.c.bf16 %v293_v23, %v285_v22  ;;  %v680_v17 = vld [vmem:[#allocation5 + $0x10] sm:$0xff]  ;;  %v283_v22 = vld [vmem:[#allocation3 + $0x618] sm:$0xff]  ;;  %v1914_v25 = vpack.c.bf16 %v274_v19, %v266_v13  ;;  %v698_v13 = vld [vmem:[#allocation5 + $0xa0] sm:$0xff] }
  0x73   :  { %1877 = vmatprep.subr.bf16.mxu1 %v1876_v34  ;;  %v301_v34 = vld [vmem:[#allocation3 + $0x6a8] sm:$0xff]  ;;  %v291_v23 = vld [vmem:[#allocation3 + $0x658] sm:$0xff]  ;;  %v2062_v24 = vpack.c.bf16 %v680_v17, %v678_v16  ;;  %v102_v17 = vld [vmem:[#allocation3 + $0x70] sm:$0xff] }
  0x74   :  { %v1916_v30 = vpack.c.bf16 %v291_v23, %v283_v22  ;;  %v705_v19 = vld [vmem:[#allocation5 + $0xd8] sm:$0xff] }
  0x75   :  { %1979 = vmatpush1.bf16.msra.mxu0 %v1978_v26  ;;  %v282_v26 = vld [vmem:[#allocation3 + $0x610] sm:$0xff] }
  0x76   :  { %1879 = vmatpush1.bf16.msra.mxu1 %v1878_v41  ;;  %1981 = vmatprep.subr.bf16.mxu0 %v1980_v29  ;;  %v1984_v41 = vpack.c.bf16 %v309_v35, %v301_v34  ;;  %v684_v29 = vld [vmem:[#allocation5 + $0x30] sm:$0xff]  ;;  %v299_v34 = vld [vmem:[#allocation3 + $0x698] sm:$0xff]  ;;  %v1918_v37 = vpack.c.bf16 %v290_v31, %v282_v26  ;;  %v702_v26 = vld [vmem:[#allocation5 + $0xc0] sm:$0xff] }
  0x77   :  { %1881 = vmatprep.subr.bf16.mxu1 %v1880_v47  ;;  %v317_v47 = vld [vmem:[#allocation3 + $0x728] sm:$0xff]  ;;  %v307_v35 = vld [vmem:[#allocation3 + $0x6d8] sm:$0xff]  ;;  %v2066_v36 = vpack.c.bf16 %v684_v29, %v682_v28  ;;  %v118_v29 = vld [vmem:[#allocation3 + $0xf0] sm:$0xff] }
  0x78   :  { %v1920_v43 = vpack.c.bf16 %v307_v35, %v299_v34  ;;  %v709_v31 = vld [vmem:[#allocation5 + $0xf8] sm:$0xff] }
  0x79   :  { %1983 = vmatpush1.bf16.msra.mxu0 %v1982_v38  ;;  %v298_v38 = vld [vmem:[#allocation3 + $0x690] sm:$0xff] }
  0x7a   :  { %1883 = vmatpush1.bf16.msra.mxu1 %v1882_v54  ;;  %1985 = vmatprep.subr.bf16.mxu0 %v1984_v41  ;;  %v1988_v54 = vpack.c.bf16 %v325_v48, %v317_v47  ;;  %v688_v41 = vld [vmem:[#allocation5 + $0x50] sm:$0xff]  ;;  %v315_v47 = vld [vmem:[#allocation3 + $0x718] sm:$0xff]  ;;  %v1922_v50 = vpack.c.bf16 %v306_v44, %v298_v38  ;;  %v706_v38 = vld [vmem:[#allocation5 + $0xe0] sm:$0xff] }
  0x7b   :  { %1885 = vmatprep.subr.bf16.mxu1 %v1884_v59  ;;  %v333_v59 = vld [vmem:[#allocation3 + $0x7a8] sm:$0xff]  ;;  %v323_v48 = vld [vmem:[#allocation3 + $0x758] sm:$0xff]  ;;  %v2070_v49 = vpack.c.bf16 %v688_v41, %v686_v40  ;;  %v134_v41 = vld [vmem:[#allocation3 + $0x170] sm:$0xff] }
  0x7c   :  { %v1924_v55 = vpack.c.bf16 %v323_v48, %v315_v47  ;;  %v713_v44 = vld [vmem:[#allocation5 + $0x118] sm:$0xff] }
  0x7d   :  { %1987 = vmatpush1.bf16.msra.mxu0 %v1986_v51  ;;  %v314_v51 = vld [vmem:[#allocation3 + $0x710] sm:$0xff] }
  0x7e   :  { %1887 = vmatpush1.bf16.msra.mxu1 %v1886_v2  ;;  %1989 = vmatprep.subr.bf16.mxu0 %v1988_v54  ;;  %v1992_v2 = vpack.c.bf16 %v341_v60, %v333_v59  ;;  %v692_v54 = vld [vmem:[#allocation5 + $0x70] sm:$0xff]  ;;  %v331_v59 = vld [vmem:[#allocation3 + $0x798] sm:$0xff]  ;;  %v1926_v62 = vpack.c.bf16 %v322_v56, %v314_v51  ;;  %v710_v51 = vld [vmem:[#allocation5 + $0x100] sm:$0xff] }
  0x7f   :  { %1889 = vmatprep.subr.bf16.mxu1 %v1888_v7  ;;  %v679_v7 = vld [vmem:[#allocation5 + $0x8] sm:$0xff]  ;;  %v339_v60 = vld [vmem:[#allocation3 + $0x7d8] sm:$0xff]  ;;  %v2074_v61 = vpack.c.bf16 %v692_v54, %v690_v53  ;;  %v150_v54 = vld [vmem:[#allocation3 + $0x1f0] sm:$0xff] }
  0x80   :  { %v1928_v3 = vpack.c.bf16 %v339_v60, %v331_v59  ;;  %v717_v56 = vld [vmem:[#allocation5 + $0x138] sm:$0xff]  ;;  %v158_v60 = vld [vmem:[#allocation3 + $0x230] sm:$0xff] }
  0x81   :  { %1991 = vmatpush1.bf16.msra.mxu0 %v1990_v63  ;;  %v330_v63 = vld [vmem:[#allocation3 + $0x790] sm:$0xff] }
  0x82   :  { %1891 = vmatpush1.bf16.msra.mxu1 %v1890_v14  ;;  %1993 = vmatprep.subr.bf16.mxu0 %v1992_v2  ;;  %v2060_v14 = vpack.c.bf16 %v681_v8, %v679_v7  ;;  %v696_v2 = vld [vmem:[#allocation5 + $0x90] sm:$0xff]  ;;  %v95_v7 = vld [vmem:[#allocation3 + $0x38] sm:$0xff]  ;;  %v1930_v10 = vpack.c.bf16 %v338_v4, %v330_v63 }
  0x83   :  { %1893 = vmatprep.subr.bf16.mxu1 %v1892_v20  ;;  %v683_v20 = vld [vmem:[#allocation5 + $0x28] sm:$0xff]  ;;  %v103_v8 = vld [vmem:[#allocation3 + $0x78] sm:$0xff]  ;;  %v2078_v9 = vpack.c.bf16 %v696_v2, %v694_v1  ;;  %v716_v63 = vld [vmem:[#allocation5 + $0x130] sm:$0xff] }
  0x84   :  { %v1996_v16 = vpack.c.bf16 %v103_v8, %v95_v7  ;;  %v166_v1 = vld [vmem:[#allocation3 + $0x270] sm:$0xff]  ;;  %v719_v2 = vld [vmem:[#allocation5 + $0x148] sm:$0xff]  ;;  %v175_v4 = vld [vmem:[#allocation3 + $0x2b8] sm:$0xff] }
  0x85   :  { %1995 = vmatpush1.bf16.msra.mxu0 %v1994_v11  ;;  %v94_v11 = vld [vmem:[#allocation3 + $0x30] sm:$0xff]  ;;  %v2014_v7 = vpack.c.bf16 %v166_v1, %v158_v60  ;;  %v255_v1 = vld [vmem:[#allocation3 + $0x538] sm:$0xff] }
  0x86   :  { %1895 = vmatpush1.bf16.msra.mxu1 %v1894_v27  ;;  %2061 = vmatprep.subr.bf16.mxu0 %v2060_v14  ;;  %v2064_v27 = vpack.c.bf16 %v685_v21, %v683_v20  ;;  %v700_v14 = vld [vmem:[#allocation5 + $0xb0] sm:$0xff]  ;;  %v111_v20 = vld [vmem:[#allocation3 + $0xb8] sm:$0xff]  ;;  %v1998_v23 = vpack.c.bf16 %v102_v17, %v94_v11 }
  0x87   :  { %1897 = vmatprep.subr.bf16.mxu1 %v1896_v32  ;;  %v687_v32 = vld [vmem:[#allocation5 + $0x48] sm:$0xff]  ;;  %v119_v21 = vld [vmem:[#allocation3 + $0xf8] sm:$0xff]  ;;  %v2082_v22 = vpack.c.bf16 %v700_v14, %v698_v13  ;;  %v174_v8 = vld [vmem:[#allocation3 + $0x2b0] sm:$0xff] }
  0x88   :  { %593 = vmatmul.mubr.f32.vlgmr.msra.gmra.mrb[0].mxu0 %v2590_v15  ;;  %v2000_v28 = vpack.c.bf16 %v119_v21, %v111_v20  ;;  %v720_v11 = vld [vmem:[#allocation5 + $0x150] sm:$0xff]  ;;  %v723_v14 = vld [vmem:[#allocation5 + $0x168] sm:$0xff]  ;;  %v191_v17 = vld [vmem:[#allocation3 + $0x338] sm:$0xff] }
  0x89   :  { %2063 = vmatpush1.bf16.msra.mxu0 %v2062_v24  ;;  %v110_v24 = vld [vmem:[#allocation3 + $0xb0] sm:$0xff] }
  0x8a   :  { %1899 = vmatpush1.bf16.msra.mxu1 %v1898_v39  ;;  %2065 = vmatprep.subr.bf16.mxu0 %v2064_v27  ;;  %v2068_v39 = vpack.c.bf16 %v689_v33, %v687_v32  ;;  %v704_v27 = vld [vmem:[#allocation5 + $0xd0] sm:$0xff]  ;;  %v127_v32 = vld [vmem:[#allocation3 + $0x138] sm:$0xff]  ;;  %v2002_v35 = vpack.c.bf16 %v118_v29, %v110_v24 }
  0x8b   :  { %1901 = vmatprep.subr.bf16.mxu1 %v1900_v45  ;;  %v691_v45 = vld [vmem:[#allocation5 + $0x68] sm:$0xff]  ;;  %v135_v33 = vld [vmem:[#allocation3 + $0x178] sm:$0xff]  ;;  %v2086_v34 = vpack.c.bf16 %v704_v27, %v702_v26  ;;  %v182_v13 = vld [vmem:[#allocation3 + $0x2f0] sm:$0xff] }
  0x8c   :  { %v2004_v40 = vpack.c.bf16 %v135_v33, %v127_v32  ;;  %v2018_v20 = vpack.c.bf16 %v182_v13, %v174_v8  ;;  %v190_v21 = vld [vmem:[#allocation3 + $0x330] sm:$0xff]  ;;  %v727_v27 = vld [vmem:[#allocation5 + $0x188] sm:$0xff]  ;;  %v207_v29 = vld [vmem:[#allocation3 + $0x3b8] sm:$0xff] }
  0x8d   :  { %2067 = vmatpush1.bf16.msra.mxu0 %v2066_v36  ;;  %v126_v36 = vld [vmem:[#allocation3 + $0x130] sm:$0xff]  ;;  %v271_v13 = vld [vmem:[#allocation3 + $0x5b8] sm:$0xff] }
  0x8e   :  { %1903 = vmatpush1.bf16.msra.mxu1 %v1902_v52  ;;  %2069 = vmatprep.subr.bf16.mxu0 %v2068_v39  ;;  %v2072_v52 = vpack.c.bf16 %v693_v46, %v691_v45  ;;  %v708_v39 = vld [vmem:[#allocation5 + $0xf0] sm:$0xff]  ;;  %v143_v45 = vld [vmem:[#allocation3 + $0x1b8] sm:$0xff]  ;;  %v2006_v48 = vpack.c.bf16 %v134_v41, %v126_v36 }
  0x8f   :  { %1905 = vmatprep.subr.bf16.mxu1 %v1904_v57  ;;  %v695_v57 = vld [vmem:[#allocation5 + $0x88] sm:$0xff]  ;;  %v151_v46 = vld [vmem:[#allocation3 + $0x1f8] sm:$0xff]  ;;  %v2090_v47 = vpack.c.bf16 %v708_v39, %v706_v38  ;;  %v724_v24 = vld [vmem:[#allocation5 + $0x170] sm:$0xff] }
  0x90   :  { %v2008_v53 = vpack.c.bf16 %v151_v46, %v143_v45  ;;  %v198_v26 = vld [vmem:[#allocation3 + $0x370] sm:$0xff]  ;;  %v731_v39 = vld [vmem:[#allocation5 + $0x1a8] sm:$0xff]  ;;  %v223_v41 = vld [vmem:[#allocation3 + $0x438] sm:$0xff] }
  0x91   :  { %2071 = vmatpush1.bf16.msra.mxu0 %v2070_v49  ;;  %v142_v49 = vld [vmem:[#allocation3 + $0x1b0] sm:$0xff]  ;;  %v2022_v32 = vpack.c.bf16 %v198_v26, %v190_v21 }
  0x92   :  { %1907 = vmatpush1.bf16.msra.mxu1 %v1906_v0  ;;  %2073 = vmatprep.subr.bf16.mxu0 %v2072_v52  ;;  %v2076_v0 = vpack.c.bf16 %v697_v58, %v695_v57  ;;  %v712_v52 = vld [vmem:[#allocation5 + $0x110] sm:$0xff]  ;;  %v159_v57 = vld [vmem:[#allocation3 + $0x238] sm:$0xff]  ;;  %v2010_v59 = vpack.c.bf16 %v150_v54, %v142_v49 }
  0x93   :  { %1909 = vmatprep.subr.bf16.mxu1 %v1908_v5  ;;  %v699_v5 = vld [vmem:[#allocation5 + $0xa8] sm:$0xff]  ;;  %v167_v58 = vld [vmem:[#allocation3 + $0x278] sm:$0xff]  ;;  %v206_v33 = vld [vmem:[#allocation3 + $0x3b0] sm:$0xff] }
  0x94   :  { %v728_v36 = vld [vmem:[#allocation5 + $0x190] sm:$0xff]  ;;  %v239_v54 = vld [vmem:[#allocation3 + $0x4b8] sm:$0xff] }
  0x95   :  { %2075 = vmatpush1.bf16.msra.mxu0 %v2074_v61  ;;  %v214_v38 = vld [vmem:[#allocation3 + $0x3f0] sm:$0xff] }
  0x96   :  { %1911 = vmatpush1.bf16.msra.mxu1 %v1910_v12  ;;  %2077 = vmatprep.subr.bf16.mxu0 %v2076_v0  ;;  %v2080_v12 = vpack.c.bf16 %v701_v6, %v699_v5  ;;  %v2012_v0 = vpack.c.bf16 %v167_v58, %v159_v57  ;;  %v183_v5 = vld [vmem:[#allocation3 + $0x2f8] sm:$0xff]  ;;  %v2026_v45 = vpack.c.bf16 %v214_v38, %v206_v33  ;;  %v222_v46 = vld [vmem:[#allocation3 + $0x430] sm:$0xff] }
  0x97   :  { %1913 = vmatprep.subr.bf16.mxu1 %v1912_v18  ;;  %v703_v18 = vld [vmem:[#allocation5 + $0xc8] sm:$0xff]  ;;  %v732_v49 = vld [vmem:[#allocation5 + $0x1b0] sm:$0xff] }
  0x98   :  { %v238_v58 = vld [vmem:[#allocation3 + $0x4b0] sm:$0xff] }
  0x99   :  { %2079 = vmatpush1.bf16.msra.mxu0 %v2078_v9  ;;  %v736_v60 = vld [vmem:[#allocation5 + $0x1d0] sm:$0xff] }
  0x9a   :  { %1915 = vmatpush1.bf16.msra.mxu1 %v1914_v25  ;;  %2081 = vmatprep.subr.bf16.mxu0 %v2080_v12  ;;  %v2084_v25 = vpack.c.bf16 %v705_v19, %v703_v18  ;;  %v2016_v12 = vpack.c.bf16 %v183_v5, %v175_v4  ;;  %v199_v18 = vld [vmem:[#allocation3 + $0x378] sm:$0xff]  ;;  %v254_v5 = vld [vmem:[#allocation3 + $0x530] sm:$0xff] }
  0x9b   :  { %1917 = vmatprep.subr.bf16.mxu1 %v1916_v30  ;;  %v707_v30 = vld [vmem:[#allocation5 + $0xe8] sm:$0xff]  ;;  %v740_v8 = vld [vmem:[#allocation5 + $0x1f0] sm:$0xff] }
  0x9c   :  { %v278_v21 = vld [vmem:[#allocation3 + $0x5f0] sm:$0xff] }
  0x9d   :  { %2083 = vmatpush1.bf16.msra.mxu0 %v2082_v22  ;;  %v286_v26 = vld [vmem:[#allocation3 + $0x630] sm:$0xff] }
  0x9e   :  { %1919 = vmatpush1.bf16.msra.mxu1 %v1918_v37  ;;  %2085 = vmatprep.subr.bf16.mxu0 %v2084_v25  ;;  %v2088_v37 = vpack.c.bf16 %v709_v31, %v707_v30  ;;  %v2020_v25 = vpack.c.bf16 %v199_v18, %v191_v17  ;;  %v215_v30 = vld [vmem:[#allocation3 + $0x3f8] sm:$0xff]  ;;  %v310_v33 = vld [vmem:[#allocation3 + $0x6f0] sm:$0xff] }
  0x9f   :  { %1921 = vmatprep.subr.bf16.mxu1 %v1920_v43  ;;  %v711_v43 = vld [vmem:[#allocation5 + $0x108] sm:$0xff]  ;;  %v318_v38 = vld [vmem:[#allocation3 + $0x730] sm:$0xff] }
  0xa1   :  { %2087 = vmatpush1.bf16.msra.mxu0 %v2086_v34 }
  0xa2   :  { %1923 = vmatpush1.bf16.msra.mxu1 %v1922_v50  ;;  %2089 = vmatprep.subr.bf16.mxu0 %v2088_v37  ;;  %v2092_v50 = vpack.c.bf16 %v713_v44, %v711_v43  ;;  %v2024_v37 = vpack.c.bf16 %v215_v30, %v207_v29  ;;  %v231_v43 = vld [vmem:[#allocation3 + $0x478] sm:$0xff] }
  0xa3   :  { %1925 = vmatprep.subr.bf16.mxu1 %v1924_v55  ;;  %v715_v55 = vld [vmem:[#allocation5 + $0x128] sm:$0xff]  ;;  %v311_v29 = vld [vmem:[#allocation3 + $0x6f8] sm:$0xff] }
  0xa4   :  { %v2096_v61 = vpack.c.bf16 %v717_v56, %v715_v55  ;;  %v247_v55 = vld [vmem:[#allocation3 + $0x4f8] sm:$0xff] }
  0xa5   :  { %2091 = vmatpush1.bf16.msra.mxu0 %v2090_v47 }
  0xa6   :  { %1927 = vmatpush1.bf16.msra.mxu1 %v1926_v62  ;;  %2093 = vmatprep.subr.bf16.mxu0 %v2092_v50  ;;  %v714_v62 = vld [vmem:[#allocation5 + $0x120] sm:$0xff]  ;;  %v2028_v50 = vpack.c.bf16 %v231_v43, %v223_v41  ;;  %v343_v41 = vld [vmem:[#allocation3 + $0x7f8] sm:$0xff] }
  0xa7   :  { %1929 = vmatprep.subr.bf16.mxu1 %v1928_v3  ;;  %v721_v3 = vld [vmem:[#allocation5 + $0x158] sm:$0xff]  ;;  %v2098_v6 = vpack.c.bf16 %v716_v63, %v714_v62  ;;  %v246_v62 = vld [vmem:[#allocation3 + $0x4f0] sm:$0xff]  ;;  %v739_v63 = vld [vmem:[#allocation5 + $0x1e8] sm:$0xff] }
  0xa8   :  { %v2100_v9 = vpack.c.bf16 %v721_v3, %v719_v2  ;;  %v263_v2 = vld [vmem:[#allocation3 + $0x578] sm:$0xff]  ;;  %v2034_v4 = vpack.c.bf16 %v246_v62, %v238_v58  ;;  %v744_v58 = vld [vmem:[#allocation5 + $0x210] sm:$0xff] }
  0xaa   :  { %1931 = vmatpush1.bf16.msra.mxu1 %v1930_v10  ;;  %v718_v10 = vld [vmem:[#allocation5 + $0x140] sm:$0xff] }
  0xab   :  { %1997 = vmatprep.subr.bf16.mxu1 %v1996_v16  ;;  %v725_v16 = vld [vmem:[#allocation5 + $0x178] sm:$0xff]  ;;  %v2102_v19 = vpack.c.bf16 %v720_v11, %v718_v10  ;;  %v262_v10 = vld [vmem:[#allocation3 + $0x570] sm:$0xff]  ;;  %v743_v11 = vld [vmem:[#allocation5 + $0x208] sm:$0xff] }
  0xac   :  { %v2104_v22 = vpack.c.bf16 %v725_v16, %v723_v14  ;;  %v279_v14 = vld [vmem:[#allocation3 + $0x5f8] sm:$0xff]  ;;  %v2038_v17 = vpack.c.bf16 %v262_v10, %v254_v5 }
  0xad   :  { %522 = vmatmul.mubr.f32.vlgmr.msra.gmra.mrb[2].mxu1 %v2590_v15  ;;  %v757_v10 = vld [vmem:[#allocation5 + $0x278] sm:$0xff] }
  0xae   :  { %1999 = vmatpush1.bf16.msra.mxu1 %v1998_v23  ;;  %663 = vmatprep.mubr.f32.mxu1 %v2583_v42  ;;  %v2094_v42 = vpack.c.bf16 %v712_v52, %v710_v51  ;;  %v722_v23 = vld [vmem:[#allocation5 + $0x160] sm:$0xff]  ;;  %v230_v51 = vld [vmem:[#allocation3 + $0x470] sm:$0xff]  ;;  %v735_v52 = vld [vmem:[#allocation5 + $0x1c8] sm:$0xff] }
  0xaf   :  { %2001 = vmatprep.subr.bf16.mxu1 %v2000_v28  ;;  %v729_v28 = vld [vmem:[#allocation5 + $0x198] sm:$0xff]  ;;  %v2106_v31 = vpack.c.bf16 %v724_v24, %v722_v23  ;;  %v2030_v57 = vpack.c.bf16 %v230_v51, %v222_v46  ;;  %v342_v46 = vld [vmem:[#allocation3 + $0x7f0] sm:$0xff] }
  0xb0   :  { %2095 = vmatpush1.bf16.msra.mxu0 %v2094_v42  ;;  %v2108_v34 = vpack.c.bf16 %v729_v28, %v727_v27  ;;  %v295_v23 = vld [vmem:[#allocation3 + $0x678] sm:$0xff]  ;;  %v294_v27 = vld [vmem:[#allocation3 + $0x670] sm:$0xff] }
  0xb1   :  { %2097 = vmatprep.subr.bf16.mxu0 %v2096_v61  ;;  %v2032_v61 = vpack.c.bf16 %v247_v55, %v239_v54  ;;  %v303_v28 = vld [vmem:[#allocation3 + $0x6b8] sm:$0xff]  ;;  %v2046_v30 = vpack.c.bf16 %v294_v27, %v286_v26  ;;  %v762_v26 = vld [vmem:[#allocation5 + $0x2a0] sm:$0xff]  ;;  %v764_v27 = vld [vmem:[#allocation5 + $0x2b0] sm:$0xff] }
  0xb2   :  { %2003 = vmatpush1.bf16.msra.mxu1 %v2002_v35  ;;  %v726_v35 = vld [vmem:[#allocation5 + $0x180] sm:$0xff] }
  0xb3   :  { %2005 = vmatprep.subr.bf16.mxu1 %v2004_v40  ;;  %v733_v40 = vld [vmem:[#allocation5 + $0x1b8] sm:$0xff]  ;;  %v2110_v44 = vpack.c.bf16 %v728_v36, %v726_v35 }
  0xb4   :  { %2099 = vmatpush1.bf16.msra.mxu0 %v2098_v6  ;;  %v2112_v47 = vpack.c.bf16 %v733_v40, %v731_v39  ;;  %v327_v35 = vld [vmem:[#allocation3 + $0x778] sm:$0xff]  ;;  %v326_v39 = vld [vmem:[#allocation3 + $0x770] sm:$0xff] }
  0xb5   :  { %2101 = vmatprep.subr.bf16.mxu0 %v2100_v9  ;;  %v2036_v9 = vpack.c.bf16 %v263_v2, %v255_v1  ;;  %v335_v40 = vld [vmem:[#allocation3 + $0x7b8] sm:$0xff]  ;;  %v2054_v43 = vpack.c.bf16 %v326_v39, %v318_v38  ;;  %v746_v1 = vld [vmem:[#allocation5 + $0x220] sm:$0xff]  ;;  %v748_v2 = vld [vmem:[#allocation5 + $0x230] sm:$0xff] }
  0xb6   :  { %2007 = vmatpush1.bf16.msra.mxu1 %v2006_v48  ;;  %v730_v48 = vld [vmem:[#allocation5 + $0x1a0] sm:$0xff]  ;;  %v2130_v5 = vpack.c.bf16 %v748_v2, %v746_v1  ;;  %v772_v39 = vld [vmem:[#allocation5 + $0x2f0] sm:$0xff] }
  0xb7   :  { %2009 = vmatprep.subr.bf16.mxu1 %v2008_v53  ;;  %v737_v53 = vld [vmem:[#allocation5 + $0x1d8] sm:$0xff]  ;;  %v2114_v56 = vpack.c.bf16 %v732_v49, %v730_v48  ;;  %v346_v48 = vlaneseq  ;;  %v770_v38 = vld [vmem:[#allocation5 + $0x2e0] sm:$0xff] }
  0xb8   :  { %2103 = vmatpush1.bf16.msra.mxu0 %v2102_v19  ;;  %v2116_v42 = vpack.c.bf16 %v737_v53, %v735_v52  ;;  %v2040_v19 = vpack.c.bf16 %v279_v14, %v271_v13  ;;  %v2606_v51 = vld [vmem:[%s2858_s3] sm:$0xff]  ;;  %v756_v14 = vld [vmem:[#allocation5 + $0x270] sm:$0xff] }
  0xb9   :  { %2105 = vmatprep.subr.bf16.mxu0 %v2104_v22  ;;  %v287_v22 = vld [vmem:[#allocation3 + $0x638] sm:$0xff]  ;;  %v2598_v49 = vshrl.u32 %v346_v48, 7  ;;  %v754_v13 = vld [vmem:[#allocation5 + $0x260] sm:$0xff] }
  0xba   :  { %2011 = vmatpush1.bf16.msra.mxu1 %v2010_v59  ;;  %v734_v59 = vld [vmem:[#allocation5 + $0x1c0] sm:$0xff]  ;;  %v781_v48 = vld [vmem:[#allocation5 + $0x338] sm:$0xff] }
  0xbb   :  { %2013 = vmatprep.subr.bf16.mxu1 %v2012_v0  ;;  %v741_v0 = vld [vmem:[#allocation5 + $0x1f8] sm:$0xff]  ;;  %v2118_v3 = vpack.c.bf16 %v736_v60, %v734_v59  ;;  %v352_v52 = vsub.s32 1, %v2598_v49  ;;  %v747_v59 = vld [vmem:[#allocation5 + $0x228] sm:$0xff] }
  0xbc   :  { %2107 = vmatpush1.bf16.msra.mxu0 %v2106_v31  ;;  %v2120_v6 = vpack.c.bf16 %v741_v0, %v739_v63  ;;  %v2048_v31 = vpack.c.bf16 %v311_v29, %v303_v28  ;;  %v749_v60 = vld [vmem:[#allocation5 + $0x238] sm:$0xff]  ;;  %v767_v28 = vld [vmem:[#allocation5 + $0x2c8] sm:$0xff] }
  0xbd   :  { %2109 = vmatprep.subr.bf16.mxu0 %v2108_v34  ;;  %v319_v34 = vld [vmem:[#allocation3 + $0x738] sm:$0xff]  ;;  %v2128_v0 = vpack.c.bf16 %v749_v60, %v747_v59  ;;  %v782_v59 = vld [vmem:[#allocation5 + $0x340] sm:$0xff]  ;;  %v784_v60 = vld [vmem:[#allocation5 + $0x350] sm:$0xff] }
  0xbe   :  { %2015 = vmatpush1.bf16.msra.mxu1 %v2014_v7  ;;  %v738_v7 = vld [vmem:[#allocation5 + $0x1e0] sm:$0xff]  ;;  %v769_v29 = vld [vmem:[#allocation5 + $0x2d8] sm:$0xff] }
  0xbf   :  { %2017 = vmatprep.subr.bf16.mxu1 %v2016_v12  ;;  %v745_v12 = vld [vmem:[#allocation5 + $0x218] sm:$0xff]  ;;  %v2122_v16 = vpack.c.bf16 %v740_v8, %v738_v7  ;;  %v750_v7 = vld [vmem:[#allocation5 + $0x240] sm:$0xff]  ;;  %v752_v8 = vld [vmem:[#allocation5 + $0x250] sm:$0xff] }
  0xc0   :  { %2111 = vmatpush1.bf16.msra.mxu0 %v2110_v44  ;;  %v2124_v18 = vpack.c.bf16 %v745_v12, %v743_v11  ;;  %v2056_v44 = vpack.c.bf16 %v343_v41, %v335_v40  ;;  %v2134_v11 = vpack.c.bf16 %v752_v8, %v750_v7  ;;  %v775_v40 = vld [vmem:[#allocation5 + $0x308] sm:$0xff]  ;;  %v777_v41 = vld [vmem:[#allocation5 + $0x318] sm:$0xff] }
  0xc1   :  { %2113 = vmatprep.subr.bf16.mxu0 %v2112_v47 }
  0xc2   :  { %2019 = vmatpush1.bf16.msra.mxu1 %v2018_v20  ;;  %v270_v20 = vld [vmem:[#allocation3 + $0x5b0] sm:$0xff] }
  0xc3   :  { %2021 = vmatprep.subr.bf16.mxu1 %v2020_v25  ;;  %v2042_v24 = vpack.c.bf16 %v278_v21, %v270_v20  ;;  %v2044_v25 = vpack.c.bf16 %v295_v23, %v287_v22  ;;  %v758_v20 = vld [vmem:[#allocation5 + $0x280] sm:$0xff]  ;;  %v760_v21 = vld [vmem:[#allocation5 + $0x290] sm:$0xff]  ;;  %v763_v22 = vld [vmem:[#allocation5 + $0x2a8] sm:$0xff] }
  0xc4   :  { %2115 = vmatpush1.bf16.msra.mxu0 %v2114_v56  ;;  %v765_v23 = vld [vmem:[#allocation5 + $0x2b8] sm:$0xff] }
  0xc5   :  { %2117 = vmatprep.subr.bf16.mxu0 %v2116_v42 }
  0xc6   :  { %2023 = vmatpush1.bf16.msra.mxu1 %v2022_v32  ;;  %v302_v32 = vld [vmem:[#allocation3 + $0x6b0] sm:$0xff] }
  0xc7   :  { %2025 = vmatprep.subr.bf16.mxu1 %v2024_v37  ;;  %v2050_v36 = vpack.c.bf16 %v310_v33, %v302_v32  ;;  %v2052_v37 = vpack.c.bf16 %v327_v35, %v319_v34  ;;  %v766_v32 = vld [vmem:[#allocation5 + $0x2c0] sm:$0xff]  ;;  %v768_v33 = vld [vmem:[#allocation5 + $0x2d0] sm:$0xff]  ;;  %v771_v34 = vld [vmem:[#allocation5 + $0x2e8] sm:$0xff] }
  0xc8   :  { %2119 = vmatpush1.bf16.msra.mxu0 %v2118_v3  ;;  %v751_v3 = vld [vmem:[#allocation5 + $0x248] sm:$0xff]  ;;  %v773_v35 = vld [vmem:[#allocation5 + $0x2f8] sm:$0xff] }
  0xc9   :  { %2121 = vmatprep.subr.bf16.mxu0 %v2120_v6 }
  0xca   :  { %2027 = vmatpush1.bf16.msra.mxu1 %v2026_v45  ;;  %v334_v45 = vld [vmem:[#allocation3 + $0x7b0] sm:$0xff] }
  0xcb   :  { %2029 = vmatprep.subr.bf16.mxu1 %v2028_v50  ;;  %v2058_v47 = vpack.c.bf16 %v342_v46, %v334_v45  ;;  %v2601_v50 = vsub.s32 0, %v2598_v49  ;;  %v774_v45 = vld [vmem:[#allocation5 + $0x300] sm:$0xff]  ;;  %v776_v46 = vld [vmem:[#allocation5 + $0x310] sm:$0xff] }
  0xcc   :  { %2123 = vmatpush1.bf16.msra.mxu0 %v2122_v16  ;;  %v759_v16 = vld [vmem:[#allocation5 + $0x288] sm:$0xff] }
  0xcd   :  { %2125 = vmatprep.subr.bf16.mxu0 %v2124_v18  ;;  %v349_v53 = vrot.slane %v2606_v51, %v2601_v50  ;;  %v2138_v18 = vpack.c.bf16 %v756_v14, %v754_v13 }
  0xce   :  { %2031 = vmatpush1.bf16.msra.mxu1 %v2030_v57  ;;  %v742_v57 = vld [vmem:[#allocation5 + $0x200] sm:$0xff] }
  0xcf   :  { %2033 = vmatprep.subr.bf16.mxu1 %v2032_v61  ;;  %v2126_v62 = vpack.c.bf16 %v744_v58, %v742_v57  ;;  %v785_v57 = vld [vmem:[#allocation5 + $0x358] sm:$0xff] }
  0xd2   :  { %2035 = vmatpush1.bf16.msra.mxu1 %v2034_v4  ;;  %v753_v4 = vld [vmem:[#allocation5 + $0x258] sm:$0xff] }
  0xd3   :  { %2037 = vmatprep.subr.bf16.mxu1 %v2036_v9  ;;  %v2132_v6 = vpack.c.bf16 %v753_v4, %v751_v3  ;;  %v755_v9 = vld [vmem:[#allocation5 + $0x268] sm:$0xff]  ;;  %v786_v3 = vld [vmem:[#allocation5 + $0x360] sm:$0xff]  ;;  %v788_v4 = vld [vmem:[#allocation5 + $0x370] sm:$0xff] }
  0xd4   :  { %v2136_v12 = vpack.c.bf16 %v757_v10, %v755_v9  ;;  %v2170_v7 = vpack.c.bf16 %v788_v4, %v786_v3  ;;  %v790_v9 = vld [vmem:[#allocation5 + $0x380] sm:$0xff]  ;;  %v792_v10 = vld [vmem:[#allocation5 + $0x390] sm:$0xff] }
  0xd5   :  { %v2174_v13 = vpack.c.bf16 %v792_v10, %v790_v9 }
  0xd6   :  { %2039 = vmatpush1.bf16.msra.mxu1 %v2038_v17  ;;  %v761_v17 = vld [vmem:[#allocation5 + $0x298] sm:$0xff] }
  0xd7   :  { %2041 = vmatprep.subr.bf16.mxu1 %v2040_v19  ;;  %v2140_v19 = vpack.c.bf16 %v761_v17, %v759_v16  ;;  %v794_v16 = vld [vmem:[#allocation5 + $0x3a0] sm:$0xff]  ;;  %v796_v17 = vld [vmem:[#allocation5 + $0x3b0] sm:$0xff] }
  0xda   :  { %2043 = vmatpush1.bf16.msra.mxu1 %v2042_v24  ;;  %v2142_v24 = vpack.c.bf16 %v760_v21, %v758_v20  ;;  %v2178_v20 = vpack.c.bf16 %v796_v17, %v794_v16  ;;  %v368_v21 = vsub.s32 5, %v2598_v49  ;;  %v821_v16 = vld [vmem:[#allocation5 + $0x478] sm:$0xff]  ;;  %v1253_v17 = vld [vmem:[%s2861_s6 + $0xa8] sm:$0xff] }
  0xdb   :  { %2045 = vmatprep.subr.bf16.mxu1 %v2044_v25  ;;  %v2144_v25 = vpack.c.bf16 %v765_v23, %v763_v22  ;;  %v798_v23 = vld [vmem:[#allocation5 + $0x3c0] sm:$0xff] }
  0xde   :  { %2047 = vmatpush1.bf16.msra.mxu1 %v2046_v30  ;;  %v2146_v30 = vpack.c.bf16 %v764_v27, %v762_v26  ;;  %v360_v26 = vsub.s32 3, %v2598_v49  ;;  %v803_v27 = vld [vmem:[#allocation5 + $0x3e8] sm:$0xff] }
  0xdf   :  { %2049 = vmatprep.subr.bf16.mxu1 %v2048_v31  ;;  %v2148_v31 = vpack.c.bf16 %v769_v29, %v767_v28  ;;  %v805_v28 = vld [vmem:[#allocation5 + $0x3f8] sm:$0xff] }
  0xe2   :  { %2051 = vmatpush1.bf16.msra.mxu1 %v2050_v36  ;;  %v2150_v36 = vpack.c.bf16 %v768_v33, %v766_v32  ;;  %v2184_v32 = vpack.c.bf16 %v805_v28, %v803_v27  ;;  %v802_v33 = vld [vmem:[#allocation5 + $0x3e0] sm:$0xff]  ;;  %v1255_v27 = vld [vmem:[%s2861_s6 + $0xb8] sm:$0xff]  ;;  %v823_v28 = vld [vmem:[#allocation5 + $0x488] sm:$0xff] }
  0xe3   :  { %2053 = vmatprep.subr.bf16.mxu1 %v2052_v37  ;;  %v2152_v37 = vpack.c.bf16 %v773_v35, %v771_v34  ;;  %v804_v34 = vld [vmem:[#allocation5 + $0x3f0] sm:$0xff]  ;;  %v361_v35 = vrot.slane %v2606_v51, %v360_v26 }
  0xe4   :  { %v1254_v26 = vld [vmem:[%s2861_s6 + $0xb0] sm:$0xff] }
  0xe6   :  { %2055 = vmatpush1.bf16.msra.mxu1 %v2054_v43  ;;  %v2154_v43 = vpack.c.bf16 %v772_v39, %v770_v38  ;;  %v2186_v39 = vpack.c.bf16 %v804_v34, %v802_v33  ;;  %v2328_v33 = vpack.c.bf16 %v1255_v27, %v1254_v26  ;;  %v1238_v34 = vld [vmem:[%s2861_s6 + $0x30] sm:$0xff]  ;;  %v849_v26 = vld [vmem:[#allocation5 + $0x558] sm:$0xff] }
  0xe7   :  { %2057 = vmatprep.subr.bf16.mxu1 %v2056_v44  ;;  %v2156_v44 = vpack.c.bf16 %v777_v41, %v775_v40 }
  0xea   :  { %2059 = vmatpush1.bf16.msra.mxu1 %v2058_v47  ;;  %v779_v47 = vld [vmem:[#allocation5 + $0x328] sm:$0xff] }
  0xed   :  { %664 = vmatmul.mubr.f32.vlgmr.msra.gmra.mrb[4].mxu1 %v2590_v15  ;;  %v353_v15 = vrot.slane %v2606_v51, %v352_v52 }
 0x140   :  { %v452_v54 = vpop.f32.mrb[0].mxu1 }
 0x141   :  { %v453_v55 = vadd.f32 %v452_v54, %v349_v53  ;;  %v454_v56 = vpop.f32.mrb[1].mxu1  ;;  %v2158_v53 = vpack.c.bf16 %v776_v46, %v774_v45  ;;  %v778_v54 = vld [vmem:[#allocation5 + $0x320] sm:$0xff]  ;;  %v808_v46 = vld [vmem:[#allocation5 + $0x410] sm:$0xff] }
 0x142   :  { %v455_v42 = vadd.f32 %v454_v56, %v353_v15  ;;  %v2160_v15 = vpack.c.bf16 %v781_v48, %v779_v47  ;;  %v783_v56 = vld [vmem:[#allocation5 + $0x348] sm:$0xff]  ;;  %v806_v45 = vld [vmem:[#allocation5 + $0x400] sm:$0xff] }
 0x143   :  { %v670_v63 = vmax.f32 %v453_v55, 0.0  ;;  %v780_v55 = vld [vmem:[#allocation5 + $0x330] sm:$0xff]  ;;  %v811_v48 = vld [vmem:[#allocation5 + $0x428] sm:$0xff] }
 0x144   :  { %v671_v61 = vmax.f32 %v455_v42, 0.0  ;;  %v2162_v58 = vpack.c.bf16 %v780_v55, %v778_v54  ;;  %v2164_v42 = vpack.c.bf16 %v785_v57, %v783_v56  ;;  %v2190_v54 = vpack.c.bf16 %v808_v46, %v806_v45  ;;  %v826_v45 = vld [vmem:[#allocation5 + $0x4a0] sm:$0xff] }
 0x146   :  { %1010 = vmatprep.mubr.f32.mxu0 %v671_v61  ;;  %v787_v61 = vld [vmem:[#allocation5 + $0x368] sm:$0xff] }
 0x147   :  { %1011 = vmatmul.mubr.f32.vlgmr.msra.gmra.mrb[2].mxu0 %v670_v63 }
 0x148   :  { %2127 = vmatpush1.bf16.msra.mxu0 %v2126_v62  ;;  %v789_v62 = vld [vmem:[#allocation5 + $0x378] sm:$0xff] }
 0x149   :  { %2129 = vmatprep.subr.bf16.mxu0 %v2128_v0  ;;  %v2166_v0 = vpack.c.bf16 %v784_v60, %v782_v59  ;;  %v2168_v2 = vpack.c.bf16 %v789_v62, %v787_v61  ;;  %v815_v59 = vld [vmem:[#allocation5 + $0x448] sm:$0xff]  ;;  %v817_v60 = vld [vmem:[#allocation5 + $0x458] sm:$0xff]  ;;  %v814_v61 = vld [vmem:[#allocation5 + $0x440] sm:$0xff] }
 0x14a   :  { %v816_v62 = vld [vmem:[#allocation5 + $0x450] sm:$0xff] }
 0x14c   :  { %2131 = vmatpush1.bf16.msra.mxu0 %v2130_v5  ;;  %v791_v5 = vld [vmem:[#allocation5 + $0x388] sm:$0xff] }
 0x14d   :  { %2133 = vmatprep.subr.bf16.mxu0 %v2132_v6  ;;  %v793_v6 = vld [vmem:[#allocation5 + $0x398] sm:$0xff] }
 0x14e   :  { %v2172_v8 = vpack.c.bf16 %v793_v6, %v791_v5  ;;  %v1233_v5 = vld [vmem:[%s2861_s6 + $0x8] sm:$0xff]  ;;  %v1250_v6 = vld [vmem:[%s2861_s6 + $0x90] sm:$0xff] }
 0x150   :  { %2135 = vmatpush1.bf16.msra.mxu0 %v2134_v11  ;;  %v795_v11 = vld [vmem:[#allocation5 + $0x3a8] sm:$0xff] }
 0x151   :  { %2137 = vmatprep.subr.bf16.mxu0 %v2136_v12  ;;  %v797_v12 = vld [vmem:[#allocation5 + $0x3b8] sm:$0xff] }
 0x152   :  { %v2176_v14 = vpack.c.bf16 %v797_v12, %v795_v11  ;;  %v1234_v11 = vld [vmem:[%s2861_s6 + $0x10] sm:$0xff]  ;;  %v1235_v12 = vld [vmem:[%s2861_s6 + $0x18] sm:$0xff] }
 0x154   :  { %2139 = vmatpush1.bf16.msra.mxu0 %v2138_v18  ;;  %v799_v18 = vld [vmem:[#allocation5 + $0x3c8] sm:$0xff] }
 0x155   :  { %2141 = vmatprep.subr.bf16.mxu0 %v2140_v19  ;;  %v801_v19 = vld [vmem:[#allocation5 + $0x3d8] sm:$0xff] }
 0x156   :  { %v2180_v22 = vpack.c.bf16 %v801_v19, %v799_v18  ;;  %v2322_v18 = vpack.c.bf16 %v1235_v12, %v1234_v11  ;;  %v2198_v19 = vpack.c.bf16 %v816_v62, %v814_v61  ;;  %v1242_v61 = vld [vmem:[%s2861_s6 + $0x50] sm:$0xff]  ;;  %v1243_v62 = vld [vmem:[%s2861_s6 + $0x58] sm:$0xff] }
 0x157   :  { %v836_v11 = vld [vmem:[#allocation5 + $0x4f0] sm:$0xff]  ;;  %v839_v12 = vld [vmem:[#allocation5 + $0x508] sm:$0xff] }
 0x158   :  { %2143 = vmatpush1.bf16.msra.mxu0 %v2142_v24  ;;  %v800_v24 = vld [vmem:[#allocation5 + $0x3d0] sm:$0xff] }
 0x159   :  { %2145 = vmatprep.subr.bf16.mxu0 %v2144_v25  ;;  %v356_v25 = vsub.s32 2, %v2598_v49  ;;  %v2182_v29 = vpack.c.bf16 %v800_v24, %v798_v23  ;;  %v1237_v23 = vld [vmem:[%s2861_s6 + $0x28] sm:$0xff] }
 0x15b   :  { %v2614_v63 = vpop.f32.mrb[0].mxu0 }
 0x15c   :  { %2147 = vmatpush1.bf16.msra.mxu0 %v2146_v30  ;;  %v596_v1 = vpop.f32.mrb[1].mxu0  ;;  %v369_v30 = vrot.slane %v2606_v51, %v368_v21 }
 0x15d   :  { %2149 = vmatprep.subr.bf16.mxu0 %v2148_v31  ;;  %v357_v31 = vrot.slane %v2606_v51, %v356_v25  ;;  %v820_v25 = vld [vmem:[#allocation5 + $0x470] sm:$0xff] }
 0x15e   :  { %v597_v40 = vadd.f32 %v596_v1, %v369_v30  ;;  %v1249_v1 = vld [vmem:[%s2861_s6 + $0x88] sm:$0xff] }
 0x160   :  { %2151 = vmatpush1.bf16.msra.mxu0 %v2150_v36  ;;  %v807_v36 = vld [vmem:[#allocation5 + $0x408] sm:$0xff]  ;;  %v675_v55 = vmax.f32 %v597_v40, 0.0 }
 0x161   :  { %2153 = vmatprep.subr.bf16.mxu0 %v2152_v37  ;;  %v809_v37 = vld [vmem:[#allocation5 + $0x418] sm:$0xff]  ;;  %v827_v40 = vld [vmem:[#allocation5 + $0x4a8] sm:$0xff] }
 0x164   :  { %2155 = vmatpush1.bf16.msra.mxu0 %v2154_v43 }
 0x165   :  { %2157 = vmatprep.subr.bf16.mxu0 %v2156_v44  ;;  %v2188_v44 = vpack.c.bf16 %v809_v37, %v807_v36  ;;  %v824_v37 = vld [vmem:[#allocation5 + $0x490] sm:$0xff] }
 0x168   :  { %2159 = vmatpush1.bf16.msra.mxu0 %v2158_v53  ;;  %v813_v53 = vld [vmem:[#allocation5 + $0x438] sm:$0xff] }
 0x169   :  { %2161 = vmatprep.subr.bf16.mxu0 %v2160_v15  ;;  %v2192_v57 = vpack.c.bf16 %v813_v53, %v811_v48  ;;  %v1241_v48 = vld [vmem:[%s2861_s6 + $0x48] sm:$0xff] }
 0x16c   :  { %2163 = vmatpush1.bf16.msra.mxu0 %v2162_v58  ;;  %v810_v58 = vld [vmem:[#allocation5 + $0x420] sm:$0xff] }
 0x16d   :  { %2165 = vmatprep.subr.bf16.mxu0 %v2164_v42  ;;  %v812_v42 = vld [vmem:[#allocation5 + $0x430] sm:$0xff] }
 0x16e   :  { %v2194_v3 = vpack.c.bf16 %v812_v42, %v810_v58 }
 0x170   :  { %2167 = vmatpush1.bf16.msra.mxu0 %v2166_v0  ;;  %v1248_v0 = vld [vmem:[%s2861_s6 + $0x80] sm:$0xff] }
 0x171   :  { %2169 = vmatprep.subr.bf16.mxu0 %v2168_v2  ;;  %v1232_v2 = vld [vmem:[%s2861_s6] sm:$0xff]  ;;  %v2316_v4 = vpack.c.bf16 %v1249_v1, %v1248_v0  ;;  %v832_v1 = vld [vmem:[#allocation5 + $0x4d0] sm:$0xff] }
 0x172   :  { %v2318_v9 = vpack.c.bf16 %v1233_v5, %v1232_v2  ;;  %v1260_v2 = vld [vmem:[%s2861_s6 + $0xe0] sm:$0xff] }
 0x173   :  { %2317 = vmatprep.subr.bf16.mxu1 %v2316_v4  ;;  %v835_v4 = vld [vmem:[#allocation5 + $0x4e8] sm:$0xff]  ;;  %v837_v5 = vld [vmem:[#allocation5 + $0x4f8] sm:$0xff] }
 0x174   :  { %2171 = vmatpush1.bf16.msra.mxu0 %v2170_v7  ;;  %v1251_v7 = vld [vmem:[%s2861_s6 + $0x98] sm:$0xff]  ;;  %2319 = vmatpush3.bf16.msra.mxu1 %v2318_v9  ;;  %v2216_v9 = vpack.c.bf16 %v837_v5, %v835_v4  ;;  %v871_v4 = vld [vmem:[#allocation5 + $0x608] sm:$0xff] }
 0x175   :  { %2173 = vmatprep.subr.bf16.mxu0 %v2172_v8  ;;  %v2196_v8 = vpack.c.bf16 %v817_v60, %v815_v59  ;;  %v2320_v10 = vpack.c.bf16 %v1251_v7, %v1250_v6  ;;  %v830_v59 = vld [vmem:[#allocation5 + $0x4c0] sm:$0xff]  ;;  %v2338_v6 = vpack.c.bf16 %v1243_v62, %v1242_v61  ;;  %v376_v61 = vsub.s32 7, %v2598_v49  ;;  %v873_v5 = vld [vmem:[#allocation5 + $0x618] sm:$0xff] }
 0x176   :  { %v2214_v7 = vpack.c.bf16 %v832_v1, %v830_v59  ;;  %v867_v59 = vld [vmem:[#allocation5 + $0x5e8] sm:$0xff] }
 0x177   :  { %2321 = vmatprep.subr.bf16.mxu1 %v2320_v10  ;;  %v834_v10 = vld [vmem:[#allocation5 + $0x4e0] sm:$0xff] }
 0x178   :  { %2175 = vmatpush1.bf16.msra.mxu0 %v2174_v13  ;;  %v1252_v13 = vld [vmem:[%s2861_s6 + $0xa0] sm:$0xff]  ;;  %2323 = vmatpush3.bf16.msra.mxu1 %v2322_v18  ;;  %v840_v18 = vld [vmem:[#allocation5 + $0x510] sm:$0xff] }
 0x179   :  { %2177 = vmatprep.subr.bf16.mxu0 %v2176_v14  ;;  %v819_v14 = vld [vmem:[#allocation5 + $0x468] sm:$0xff]  ;;  %v2324_v21 = vpack.c.bf16 %v1253_v17, %v1252_v13  ;;  %v841_v13 = vld [vmem:[#allocation5 + $0x518] sm:$0xff]  ;;  %v838_v17 = vld [vmem:[#allocation5 + $0x500] sm:$0xff] }
 0x17a   :  { %v2200_v24 = vpack.c.bf16 %v821_v16, %v819_v14  ;;  %v2218_v14 = vpack.c.bf16 %v836_v11, %v834_v10  ;;  %v2220_v16 = vpack.c.bf16 %v841_v13, %v839_v12  ;;  %v2252_v10 = vpack.c.bf16 %v873_v5, %v871_v4  ;;  %v870_v11 = vld [vmem:[#allocation5 + $0x600] sm:$0xff]  ;;  %v872_v12 = vld [vmem:[#allocation5 + $0x610] sm:$0xff]  ;;  %v907_v5 = vld [vmem:[#allocation5 + $0x728] sm:$0xff] }
 0x17b   :  { %2325 = vmatprep.subr.bf16.mxu1 %v2324_v21  ;;  %v2222_v21 = vpack.c.bf16 %v840_v18, %v838_v17  ;;  %v904_v4 = vld [vmem:[#allocation5 + $0x710] sm:$0xff] }
 0x17c   :  { %2179 = vmatpush1.bf16.msra.mxu0 %v2178_v20  ;;  %v818_v20 = vld [vmem:[#allocation5 + $0x460] sm:$0xff] }
 0x17d   :  { %2181 = vmatprep.subr.bf16.mxu0 %v2180_v22  ;;  %v1236_v22 = vld [vmem:[%s2861_s6 + $0x20] sm:$0xff] }
 0x17e   :  { %v2326_v30 = vpack.c.bf16 %v1237_v23, %v1236_v22  ;;  %v842_v23 = vld [vmem:[#allocation5 + $0x520] sm:$0xff] }
 0x180   :  { %2183 = vmatpush1.bf16.msra.mxu0 %v2182_v29  ;;  %v523_v38 = vpop.f32.mrb[2].mxu1  ;;  %v825_v29 = vld [vmem:[#allocation5 + $0x498] sm:$0xff]  ;;  %2327 = vmatpush3.bf16.msra.mxu1 %v2326_v30  ;;  %v848_v30 = vld [vmem:[#allocation5 + $0x550] sm:$0xff] }
 0x181   :  { %v524_v41 = vadd.f32 %v523_v38, %v357_v31  ;;  %v525_v43 = vpop.f32.mrb[3].mxu1  ;;  %2185 = vmatprep.subr.bf16.mxu0 %v2184_v32  ;;  %v2202_v31 = vpack.c.bf16 %v820_v25, %v818_v20  ;;  %v822_v32 = vld [vmem:[#allocation5 + $0x480] sm:$0xff]  ;;  %v2204_v36 = vpack.c.bf16 %v825_v29, %v823_v28  ;;  %2329 = vmatprep.subr.bf16.mxu1 %v2328_v33  ;;  %v845_v20 = vld [vmem:[#allocation5 + $0x538] sm:$0xff]  ;;  %v847_v25 = vld [vmem:[#allocation5 + $0x548] sm:$0xff] }
 0x182   :  { %v526_v47 = vadd.f32 %v525_v43, %v361_v35  ;;  %v1239_v35 = vld [vmem:[%s2861_s6 + $0x38] sm:$0xff]  ;;  %v1256_v38 = vld [vmem:[%s2861_s6 + $0xc0] sm:$0xff]  ;;  %v2228_v28 = vpack.c.bf16 %v849_v26, %v847_v25 }
 0x183   :  { %v672_v56 = vmax.f32 %v524_v41, 0.0  ;;  %v829_v41 = vld [vmem:[#allocation5 + $0x4b8] sm:$0xff]  ;;  %v2330_v43 = vpack.c.bf16 %v1239_v35, %v1238_v34  ;;  %v846_v29 = vld [vmem:[#allocation5 + $0x540] sm:$0xff] }
 0x184   :  { %v673_v15 = vmax.f32 %v526_v47, 0.0  ;;  %2187 = vmatpush1.bf16.msra.mxu0 %v2186_v39  ;;  %v1257_v39 = vld [vmem:[%s2861_s6 + $0xc8] sm:$0xff]  ;;  %v1240_v47 = vld [vmem:[%s2861_s6 + $0x40] sm:$0xff]  ;;  %v2208_v53 = vpack.c.bf16 %v829_v41, %v827_v40  ;;  %v2230_v33 = vpack.c.bf16 %v848_v30, %v846_v29 }
 0x185   :  { %2189 = vmatprep.subr.bf16.mxu0 %v2188_v44  ;;  %v2206_v44 = vpack.c.bf16 %v824_v37, %v822_v32  ;;  %v2332_v46 = vpack.c.bf16 %v1257_v39, %v1256_v38  ;;  %2331 = vmatpush3.bf16.msra.mxu1 %v2330_v43  ;;  %v2334_v58 = vpack.c.bf16 %v1241_v48, %v1240_v47  ;;  %v853_v32 = vld [vmem:[#allocation5 + $0x578] sm:$0xff]  ;;  %v850_v35 = vld [vmem:[#allocation5 + $0x560] sm:$0xff]  ;;  %v855_v37 = vld [vmem:[#allocation5 + $0x588] sm:$0xff] }
 0x186   :  { %1081 = vmatprep.mubr.f32.mxu0 %v673_v15  ;;  %v828_v15 = vld [vmem:[#allocation5 + $0x4b0] sm:$0xff]  ;;  %v857_v38 = vld [vmem:[#allocation5 + $0x598] sm:$0xff]  ;;  %v854_v41 = vld [vmem:[#allocation5 + $0x580] sm:$0xff] }
 0x187   :  { %1082 = vmatmul.mubr.f32.vlgmr.msra.gmra.mrb[2].mxu0 %v672_v56  ;;  %v831_v56 = vld [vmem:[#allocation5 + $0x4c8] sm:$0xff]  ;;  %v2210_v42 = vpack.c.bf16 %v828_v15, %v826_v45  ;;  %2333 = vmatprep.subr.bf16.mxu1 %v2332_v46  ;;  %v2236_v40 = vpack.c.bf16 %v857_v38, %v855_v37  ;;  %v856_v43 = vld [vmem:[#allocation5 + $0x590] sm:$0xff]  ;;  %v861_v45 = vld [vmem:[#allocation5 + $0x5b8] sm:$0xff] }
 0x188   :  { %2191 = vmatpush1.bf16.msra.mxu0 %v2190_v54  ;;  %1152 = vmatprep.mubr.f32.mxu0 %v675_v55  ;;  %v1258_v54 = vld [vmem:[%s2861_s6 + $0xd0] sm:$0xff]  ;;  %v1259_v55 = vld [vmem:[%s2861_s6 + $0xd8] sm:$0xff]  ;;  %v2238_v46 = vpack.c.bf16 %v856_v43, %v854_v41  ;;  %v858_v48 = vld [vmem:[#allocation5 + $0x5a0] sm:$0xff] }
 0x189   :  { %2193 = vmatprep.subr.bf16.mxu0 %v2192_v57  ;;  %v833_v57 = vld [vmem:[#allocation5 + $0x4d8] sm:$0xff]  ;;  %v2336_v60 = vpack.c.bf16 %v1259_v55, %v1258_v54  ;;  %2335 = vmatpush3.bf16.msra.mxu1 %v2334_v58  ;;  %v863_v15 = vld [vmem:[#allocation5 + $0x5c8] sm:$0xff]  ;;  %v364_v55 = vsub.s32 4, %v2598_v49  ;;  %v862_v58 = vld [vmem:[#allocation5 + $0x5c0] sm:$0xff] }
 0x18a   :  { %v2212_v0 = vpack.c.bf16 %v833_v57, %v831_v56  ;;  %v865_v54 = vld [vmem:[#allocation5 + $0x5d8] sm:$0xff]  ;;  %v883_v29 = vld [vmem:[#allocation5 + $0x668] sm:$0xff] }
 0x18b   :  { %2337 = vmatprep.subr.bf16.mxu1 %v2336_v60  ;;  %v2244_v57 = vpack.c.bf16 %v865_v54, %v863_v15  ;;  %v869_v60 = vld [vmem:[#allocation5 + $0x5f8] sm:$0xff]  ;;  %v365_v62 = vrot.slane %v2606_v51, %v364_v55  ;;  %v891_v41 = vld [vmem:[#allocation5 + $0x6a8] sm:$0xff]  ;;  %v894_v55 = vld [vmem:[#allocation5 + $0x6c0] sm:$0xff] }
 0x18c   :  { %2195 = vmatpush1.bf16.msra.mxu0 %v2194_v3  ;;  %v1261_v3 = vld [vmem:[%s2861_s6 + $0xe8] sm:$0xff]  ;;  %v2248_v1 = vpack.c.bf16 %v869_v60, %v867_v59  ;;  %v885_v30 = vld [vmem:[#allocation5 + $0x678] sm:$0xff] }
 0x18d   :  { %2197 = vmatprep.subr.bf16.mxu0 %v2196_v8  ;;  %v2340_v8 = vpack.c.bf16 %v1261_v3, %v1260_v2  ;;  %2339 = vmatpush3.bf16.msra.mxu1 %v2338_v6  ;;  %v866_v2 = vld [vmem:[#allocation5 + $0x5e0] sm:$0xff]  ;;  %v868_v3 = vld [vmem:[#allocation5 + $0x5f0] sm:$0xff]  ;;  %v377_v6 = vrot.slane %v2606_v51, %v376_v61  ;;  %v893_v43 = vld [vmem:[#allocation5 + $0x6b8] sm:$0xff] }
 0x18e   :  { %v898_v60 = vld [vmem:[#allocation5 + $0x6e0] sm:$0xff]  ;;  %v900_v61 = vld [vmem:[#allocation5 + $0x6f0] sm:$0xff] }
 0x18f   :  { %2341 = vmatprep.subr.bf16.mxu1 %v2340_v8  ;;  %v2250_v8 = vpack.c.bf16 %v868_v3, %v866_v2  ;;  %v902_v3 = vld [vmem:[#allocation5 + $0x700] sm:$0xff] }
 0x190   :  { %2199 = vmatpush1.bf16.msra.mxu0 %v2198_v19  ;;  %v843_v19 = vld [vmem:[#allocation5 + $0x528] sm:$0xff] }
 0x191   :  { %2201 = vmatprep.subr.bf16.mxu0 %v2200_v24  ;;  %v2224_v22 = vpack.c.bf16 %v845_v20, %v843_v19  ;;  %v844_v24 = vld [vmem:[#allocation5 + $0x530] sm:$0xff]  ;;  %v2254_v19 = vpack.c.bf16 %v872_v12, %v870_v11  ;;  %v911_v12 = vld [vmem:[#allocation5 + $0x748] sm:$0xff] }
 0x192   :  { %v2226_v27 = vpack.c.bf16 %v844_v24, %v842_v23  ;;  %v879_v23 = vld [vmem:[#allocation5 + $0x648] sm:$0xff]  ;;  %v881_v24 = vld [vmem:[#allocation5 + $0x658] sm:$0xff]  ;;  %v908_v11 = vld [vmem:[#allocation5 + $0x730] sm:$0xff] }
 0x193   :  { %v2260_v26 = vpack.c.bf16 %v881_v24, %v879_v23  ;;  %v916_v23 = vld [vmem:[#allocation5 + $0x770] sm:$0xff]  ;;  %v919_v24 = vld [vmem:[#allocation5 + $0x788] sm:$0xff] }
 0x194   :  { %2203 = vmatpush1.bf16.msra.mxu0 %v2202_v31  ;;  %v851_v31 = vld [vmem:[#allocation5 + $0x568] sm:$0xff] }
 0x195   :  { %2205 = vmatprep.subr.bf16.mxu0 %v2204_v36  ;;  %v2232_v34 = vpack.c.bf16 %v853_v32, %v851_v31  ;;  %v852_v36 = vld [vmem:[#allocation5 + $0x570] sm:$0xff]  ;;  %v2264_v32 = vpack.c.bf16 %v885_v30, %v883_v29  ;;  %v923_v30 = vld [vmem:[#allocation5 + $0x7a8] sm:$0xff] }
 0x196   :  { %v2234_v39 = vpack.c.bf16 %v852_v36, %v850_v35  ;;  %v887_v35 = vld [vmem:[#allocation5 + $0x688] sm:$0xff]  ;;  %v889_v36 = vld [vmem:[#allocation5 + $0x698] sm:$0xff]  ;;  %v920_v29 = vld [vmem:[#allocation5 + $0x790] sm:$0xff] }
 0x197   :  { %v2268_v38 = vpack.c.bf16 %v889_v36, %v887_v35  ;;  %v924_v35 = vld [vmem:[#allocation5 + $0x7b0] sm:$0xff]  ;;  %v927_v36 = vld [vmem:[#allocation5 + $0x7c8] sm:$0xff] }
 0x198   :  { %2207 = vmatpush1.bf16.msra.mxu0 %v2206_v44  ;;  %v859_v44 = vld [vmem:[#allocation5 + $0x5a8] sm:$0xff] }
 0x199   :  { %2209 = vmatprep.subr.bf16.mxu0 %v2208_v53  ;;  %v2240_v47 = vpack.c.bf16 %v861_v45, %v859_v44  ;;  %v860_v53 = vld [vmem:[#allocation5 + $0x5b0] sm:$0xff]  ;;  %v2272_v45 = vpack.c.bf16 %v893_v43, %v891_v41  ;;  %v926_v41 = vld [vmem:[#allocation5 + $0x7c0] sm:$0xff] }
 0x19a   :  { %v2242_v56 = vpack.c.bf16 %v860_v53, %v858_v48  ;;  %v895_v48 = vld [vmem:[#allocation5 + $0x6c8] sm:$0xff]  ;;  %v897_v53 = vld [vmem:[#allocation5 + $0x6d8] sm:$0xff]  ;;  %v928_v43 = vld [vmem:[#allocation5 + $0x7d0] sm:$0xff] }
 0x19b   :  { %v2276_v54 = vpack.c.bf16 %v897_v53, %v895_v48  ;;  %v930_v53 = vld [vmem:[#allocation5 + $0x7e0] sm:$0xff] }
 0x19c   :  { %2211 = vmatpush1.bf16.msra.mxu0 %v2210_v42  ;;  %v864_v42 = vld [vmem:[#allocation5 + $0x5d0] sm:$0xff] }
 0x19d   :  { %2213 = vmatprep.subr.bf16.mxu0 %v2212_v0  ;;  %v2246_v0 = vpack.c.bf16 %v864_v42, %v862_v58  ;;  %v901_v58 = vld [vmem:[#allocation5 + $0x6f8] sm:$0xff] }
 0x1a0   :  { %2215 = vmatpush1.bf16.msra.mxu0 %v2214_v7  ;;  %v595_v7 = vadd.f32 %v2614_v63, %v365_v62  ;;  %v876_v63 = vld [vmem:[#allocation5 + $0x630] sm:$0xff]  ;;  %v903_v62 = vld [vmem:[#allocation5 + $0x708] sm:$0xff] }
 0x1a1   :  { %2217 = vmatprep.subr.bf16.mxu0 %v2216_v9 }
 0x1a2   :  { %v674_v18 = vmax.f32 %v595_v7, 0.0  ;;  %v2286_v7 = vpack.c.bf16 %v904_v4, %v902_v3 }
 0x1a4   :  { %2219 = vmatpush1.bf16.msra.mxu0 %v2218_v14  ;;  %v875_v14 = vld [vmem:[#allocation5 + $0x628] sm:$0xff] }
 0x1a5   :  { %2221 = vmatprep.subr.bf16.mxu0 %v2220_v16  ;;  %v877_v16 = vld [vmem:[#allocation5 + $0x638] sm:$0xff] }
 0x1a8   :  { %2223 = vmatpush1.bf16.msra.mxu0 %v2222_v21  ;;  %v2256_v21 = vpack.c.bf16 %v877_v16, %v875_v14 }
 0x1a9   :  { %2225 = vmatprep.subr.bf16.mxu0 %v2224_v22  ;;  %v874_v22 = vld [vmem:[#allocation5 + $0x620] sm:$0xff] }
 0x1aa   :  { %v2258_v25 = vpack.c.bf16 %v876_v63, %v874_v22  ;;  %v914_v63 = vld [vmem:[#allocation5 + $0x760] sm:$0xff] }
 0x1ac   :  { %2227 = vmatpush1.bf16.msra.mxu0 %v2226_v27  ;;  %v878_v27 = vld [vmem:[#allocation5 + $0x640] sm:$0xff] }
 0x1ad   :  { %2229 = vmatprep.subr.bf16.mxu0 %v2228_v28  ;;  %v880_v28 = vld [vmem:[#allocation5 + $0x650] sm:$0xff] }
 0x1ae   :  { %v2262_v31 = vpack.c.bf16 %v880_v28, %v878_v27  ;;  %v918_v28 = vld [vmem:[#allocation5 + $0x780] sm:$0xff] }
 0x1b0   :  { %2231 = vmatpush1.bf16.msra.mxu0 %v2230_v33  ;;  %v882_v33 = vld [vmem:[#allocation5 + $0x660] sm:$0xff] }
 0x1b1   :  { %2233 = vmatprep.subr.bf16.mxu0 %v2232_v34  ;;  %v884_v34 = vld [vmem:[#allocation5 + $0x670] sm:$0xff] }
 0x1b2   :  { %v2266_v37 = vpack.c.bf16 %v884_v34, %v882_v33  ;;  %v922_v34 = vld [vmem:[#allocation5 + $0x7a0] sm:$0xff] }
 0x1b4   :  { %2235 = vmatpush1.bf16.msra.mxu0 %v2234_v39  ;;  %v886_v39 = vld [vmem:[#allocation5 + $0x680] sm:$0xff] }
 0x1b5   :  { %2237 = vmatprep.subr.bf16.mxu0 %v2236_v40  ;;  %v888_v40 = vld [vmem:[#allocation5 + $0x690] sm:$0xff] }
 0x1b6   :  { %v2270_v44 = vpack.c.bf16 %v888_v40, %v886_v39  ;;  %v372_v39 = vsub.s32 6, %v2598_v49  ;;  %v1344_v49 = vld [vmem:[%s2863_s8 + $0x10] sm:$0xff] }
 0x1b8   :  { %2239 = vmatpush1.bf16.msra.mxu0 %v2238_v46  ;;  %v890_v46 = vld [vmem:[#allocation5 + $0x6a0] sm:$0xff] }
 0x1b9   :  { %2241 = vmatprep.subr.bf16.mxu0 %v2240_v47  ;;  %v892_v47 = vld [vmem:[#allocation5 + $0x6b0] sm:$0xff] }
 0x1ba   :  { %v2274_v15 = vpack.c.bf16 %v892_v47, %v890_v46  ;;  %v2310_v46 = vpack.c.bf16 %v928_v43, %v926_v41  ;;  %v373_v47 = vrot.slane %v2606_v51, %v372_v39  ;;  %v1245_v51 = vld [vmem:[%s2861_s6 + $0x68] sm:$0xff]  ;;  %v1439_v39 = vld [vmem:[%s2865_s10 + $0x38] sm:$0xff]  ;;  %v1676_v41 = vld [vmem:[%s2864_s9] ss:$0 sm:$0xff] }
 0x1bb   :  { %v1545_v43 = vld [vmem:[%s2869_s14] sm:$0xff] }
 0x1bc   :  { %2243 = vmatpush1.bf16.msra.mxu0 %v2242_v56  ;;  %v896_v56 = vld [vmem:[#allocation5 + $0x6d0] sm:$0xff] }
 0x1bd   :  { %2245 = vmatprep.subr.bf16.mxu0 %v2244_v57  ;;  %v899_v57 = vld [vmem:[#allocation5 + $0x6e8] sm:$0xff]  ;;  %v2278_v42 = vpack.c.bf16 %v896_v56, %v894_v55 }
 0x1be   :  { %v2280_v59 = vpack.c.bf16 %v901_v58, %v899_v57  ;;  %v1244_v57 = vld [vmem:[%s2861_s6 + $0x60] sm:$0xff] }
 0x1bf   :  { %v2342_v58 = vpack.c.bf16 %v1245_v51, %v1244_v57  ;;  %v1549_v51 = vld [vmem:[%s2869_s14 + $0x20] sm:$0xff] }
 0x1c0   :  { %2247 = vmatpush1.bf16.msra.mxu0 %v2246_v0  ;;  %v2705_v9 = vpop.f32.mrb[4].mxu1  ;;  %v905_v0 = vld [vmem:[#allocation5 + $0x718] sm:$0xff] }
 0x1c1   :  { %2249 = vmatprep.subr.bf16.mxu0 %v2248_v1  ;;  %v667_v13 = vpop.f32.mrb[5].mxu1  ;;  %v2282_v1 = vpack.c.bf16 %v900_v61, %v898_v60  ;;  %v2284_v2 = vpack.c.bf16 %v905_v0, %v903_v62  ;;  %v666_v55 = vadd.f32 %v2705_v9, %v373_v47  ;;  %2343 = vmatpush3.bf16.msra.mxu1 %v2342_v58  ;;  %v1263_v9 = vld [vmem:[%s2861_s6 + $0xf8] sm:$0xff]  ;;  %v1246_v60 = vld [vmem:[%s2861_s6 + $0x70] sm:$0xff]  ;;  %v2458_v0 = vmov 0.0|0.0   ;;  %v1550_v58 = vld [vmem:[%s2869_s14 + $0x28] sm:$0xff] }
 0x1c2   :  { %v668_v17 = vadd.f32 %v667_v13, %v377_v6  ;;  %v909_v6 = vld [vmem:[#allocation5 + $0x738] sm:$0xff] }
 0x1c3   :  { %v913_v13 = vld [vmem:[#allocation5 + $0x758] sm:$0xff]  ;;  %v676_v56 = vmax.f32 %v666_v55, 0.0 }
 0x1c4   :  { %2251 = vmatpush1.bf16.msra.mxu0 %v2250_v8  ;;  %v677_v20 = vmax.f32 %v668_v17, 0.0  ;;  %v2288_v8 = vpack.c.bf16 %v909_v6, %v907_v5  ;;  %v2292_v16 = vpack.c.bf16 %v913_v13, %v911_v12  ;;  %v910_v17 = vld [vmem:[#allocation5 + $0x740] sm:$0xff]  ;;  %v1247_v61 = vld [vmem:[%s2861_s6 + $0x78] sm:$0xff] }
 0x1c5   :  { %2253 = vmatprep.subr.bf16.mxu0 %v2252_v10  ;;  %v906_v10 = vld [vmem:[#allocation5 + $0x720] sm:$0xff]  ;;  %v2346_v62 = vpack.c.bf16 %v1247_v61, %v1246_v60  ;;  %v1548_v55 = vld [vmem:[%s2869_s14 + $0x18] sm:$0xff] }
 0x1c6   :  { %v2290_v14 = vpack.c.bf16 %v908_v11, %v906_v10 }
 0x1c7   :  { %1153 = vmatmul.mubr.f32.vlgmr.msra.gmra.mrb[2].mxu0 %v674_v18  ;;  %v912_v18 = vld [vmem:[#allocation5 + $0x750] sm:$0xff] }
 0x1c8   :  { %2255 = vmatpush1.bf16.msra.mxu0 %v2254_v19  ;;  %1223 = vmatprep.mubr.f32.mxu0 %v677_v20  ;;  %v915_v19 = vld [vmem:[#allocation5 + $0x768] sm:$0xff]  ;;  %v917_v20 = vld [vmem:[#allocation5 + $0x778] sm:$0xff] }
 0x1c9   :  { %2257 = vmatprep.subr.bf16.mxu0 %v2256_v21  ;;  %v2294_v21 = vpack.c.bf16 %v912_v18, %v910_v17  ;;  %v2296_v22 = vpack.c.bf16 %v917_v20, %v915_v19  ;;  %v1347_v17 = vld [vmem:[%s2863_s8 + $0x28] sm:$0xff]  ;;  %v1348_v19 = vld [vmem:[%s2863_s8 + $0x30] sm:$0xff]  ;;  %v1349_v20 = vld [vmem:[%s2863_s8 + $0x38] sm:$0xff] }
 0x1cc   :  { %2259 = vmatpush1.bf16.msra.mxu0 %v2258_v25  ;;  %v921_v25 = vld [vmem:[#allocation5 + $0x798] sm:$0xff] }
 0x1cd   :  { %2261 = vmatprep.subr.bf16.mxu0 %v2260_v26  ;;  %v2298_v26 = vpack.c.bf16 %v916_v23, %v914_v63  ;;  %v2300_v27 = vpack.c.bf16 %v921_v25, %v919_v24  ;;  %v1680_v63 = vld [vmem:[%s2867_s12] ss:$0 sm:$0xff] }
 0x1ce   :  { %1526 = vrot.lane.b32.xlu0 %v1680_v63, %s2454_s21  ;;  %v1675_v24 = vld [vmem:[%s2862_s7] ss:$0 sm:$0xff] }
 0x1d0   :  { %2263 = vmatpush1.bf16.msra.mxu0 %v2262_v31  ;;  %v925_v31 = vld [vmem:[#allocation5 + $0x7b8] sm:$0xff] }
 0x1d1   :  { %2265 = vmatprep.subr.bf16.mxu0 %v2264_v32  ;;  %v2302_v32 = vpack.c.bf16 %v920_v29, %v918_v28  ;;  %v2304_v33 = vpack.c.bf16 %v925_v31, %v923_v30  ;;  %v1433_v28 = vld [vmem:[%s2865_s10 + $0x8] sm:$0xff] }
 0x1d4   :  { %2267 = vmatpush1.bf16.msra.mxu0 %v2266_v37  ;;  %v929_v37 = vld [vmem:[#allocation5 + $0x7d8] sm:$0xff] }
 0x1d5   :  { %2269 = vmatprep.subr.bf16.mxu0 %v2268_v38  ;;  %v2306_v38 = vpack.c.bf16 %v924_v35, %v922_v34  ;;  %v2308_v40 = vpack.c.bf16 %v929_v37, %v927_v36  ;;  %v1436_v35 = vld [vmem:[%s2865_s10 + $0x20] sm:$0xff]  ;;  %v1437_v36 = vld [vmem:[%s2865_s10 + $0x28] sm:$0xff] }
 0x1d6   :  { %v2367_v37 = vpack.c.bf16 %v1437_v36, %v1436_v35 }
 0x1d8   :  { %2271 = vmatpush1.bf16.msra.mxu0 %v2270_v44  ;;  %v931_v44 = vld [vmem:[#allocation5 + $0x7e8] sm:$0xff] }
 0x1d9   :  { %2273 = vmatprep.subr.bf16.mxu0 %v2272_v45  ;;  %v933_v45 = vld [vmem:[#allocation5 + $0x7f8] sm:$0xff] }
 0x1da   :  { %v2312_v48 = vpack.c.bf16 %v933_v45, %v931_v44  ;;  %v1546_v44 = vld [vmem:[%s2869_s14 + $0x8] sm:$0xff] }
 0x1dc   :  { %2275 = vmatpush1.bf16.msra.mxu0 %v2274_v15  ;;  %v932_v15 = vld [vmem:[#allocation5 + $0x7f0] sm:$0xff] }
 0x1dd   :  { %2277 = vmatprep.subr.bf16.mxu0 %v2276_v54  ;;  %v2314_v54 = vpack.c.bf16 %v932_v15, %v930_v53  ;;  %v2373_v53 = vpack.c.bf16 %v1546_v44, %v1545_v43 }
 0x1e0   :  { %2279 = vmatpush1.bf16.msra.mxu0 %v2278_v42  ;;  %v1262_v42 = vld [vmem:[%s2861_s6 + $0xf0] sm:$0xff] }
 0x1e1   :  { %2281 = vmatprep.subr.bf16.mxu0 %v2280_v59  ;;  %v2344_v59 = vpack.c.bf16 %v1263_v9, %v1262_v42  ;;  %v2379_v42 = vpack.c.bf16 %v1550_v58, %v1549_v51  ;;  %v1551_v9 = vld [vmem:[%s2869_s14 + $0x30] sm:$0xff] }
 0x1e3   :  { %2345 = vmatprep.subr.bf16.mxu1 %v2344_v59  ;;  %v1552_v59 = vld [vmem:[%s2869_s14 + $0x38] sm:$0xff] }
 0x1e4   :  { %2283 = vmatpush1.bf16.msra.mxu0 %v2282_v1  ;;  %2347 = vmatpush3.bf16.msra.mxu1 %v2346_v62  ;;  %v934_v1 = vld [vmem:[%s2860_s5] sm:$0x3]  ;;  %v2382_v60 = vpack.c.bf16 %v1552_v59, %v1551_v9 }
 0x1e5   :  { %2285 = vmatprep.subr.bf16.mxu0 %v2284_v2  ;;  %2348 = vmatprep.subr.bf16.mxu1 %v2458_v0  ;;  %v939_v2 = vrot.slane %v934_v1, %v2601_v50  ;;  %v943_v3 = vrot.slane %v934_v1, %v352_v52  ;;  %v1345_v52 = vld [vmem:[%s2863_s8 + $0x18] sm:$0xff]  ;;  %v1633_v1 = vld [vmem:[%s2871_s16] sm:$0x1]  ;;  %s2461_s16 = smov 2  }
 0x1e8   :  { %2287 = vmatpush1.bf16.msra.mxu0 %v2286_v7  ;;  %v1342_v7 = vld [vmem:[%s2863_s8] sm:$0xff] }
 0x1e9   :  { %2289 = vmatprep.subr.bf16.mxu0 %v2288_v8  ;;  %v1343_v8 = vld [vmem:[%s2863_s8 + $0x8] sm:$0xff] }
 0x1ea   :  { %v2349_v12 = vpack.c.bf16 %v1343_v8, %v1342_v7  ;;  %v1678_v8 = vld [vmem:[%s2866_s11] ss:$0 sm:$0xff] }
 0x1ec   :  { %2291 = vmatpush1.bf16.msra.mxu0 %v2290_v14  ;;  %v2352_v14 = vpack.c.bf16 %v1345_v52, %v1344_v49 }
 0x1ed   :  { %2293 = vmatprep.subr.bf16.mxu0 %v2292_v16  ;;  %v1346_v16 = vld [vmem:[%s2863_s8 + $0x20] sm:$0xff] }
 0x1ee   :  { %v2355_v18 = vpack.c.bf16 %v1347_v17, %v1346_v16 }
 0x1f0   :  { %2295 = vmatpush1.bf16.msra.mxu0 %v2294_v21  ;;  %v2358_v21 = vpack.c.bf16 %v1349_v20, %v1348_v19 }
 0x1f1   :  { %2297 = vmatprep.subr.bf16.mxu0 %v2296_v22  ;;  %v2460_v22 = vmov 0.0  }
 0x1f4   :  { %2299 = vmatpush1.bf16.msra.mxu0 %v2298_v26 }
 0x1f5   :  { %2301 = vmatprep.subr.bf16.mxu0 %v2300_v27  ;;  %v1432_v27 = vld [vmem:[%s2865_s10] sm:$0xff] }
 0x1f6   :  { %v2361_v30 = vpack.c.bf16 %v1433_v28, %v1432_v27 }
 0x1f8   :  { %2303 = vmatpush1.bf16.msra.mxu0 %v2302_v32  ;;  %v1434_v32 = vld [vmem:[%s2865_s10 + $0x10] sm:$0xff] }
 0x1f9   :  { %2305 = vmatprep.subr.bf16.mxu0 %v2304_v33  ;;  %v1435_v33 = vld [vmem:[%s2865_s10 + $0x18] sm:$0xff] }
 0x1fa   :  { %v2364_v34 = vpack.c.bf16 %v1435_v33, %v1434_v32 }
 0x1fc   :  { %2307 = vmatpush1.bf16.msra.mxu0 %v2306_v38  ;;  %v1438_v38 = vld [vmem:[%s2865_s10 + $0x30] sm:$0xff] }
 0x1fd   :  { %2309 = vmatprep.subr.bf16.mxu0 %v2308_v40  ;;  %v2370_v40 = vpack.c.bf16 %v1439_v39, %v1438_v38 }
 0x200   :  { %2311 = vmatpush1.bf16.msra.mxu0 %v2310_v46 }
 0x201   :  { %2313 = vmatprep.subr.bf16.mxu0 %v2312_v48 }
 0x204   :  { %2315 = vmatpush1.bf16.msra.mxu0 %v2314_v54  ;;  %v1547_v54 = vld [vmem:[%s2869_s14 + $0x10] sm:$0xff] }
 0x205   :  { %v2376_v57 = vpack.c.bf16 %v1548_v55, %v1547_v54 }
 0x207   :  { %1224 = vmatmul.mubr.f32.vlgmr.msra.gmra.mrb[2].mxu0 %v676_v56 }
 0x240   :  { %v1527_v48 = vpop.permute.xlu0 %1526 }
 0x2da   :  { %v1225_v4 = vpop.f32.mrb[2].mxu0 }
 0x2db   :  { %v2384_v5 = vadd.f32 %v1225_v4, %v939_v2  ;;  %v1227_v6 = vpop.f32.mrb[3].mxu0 }
 0x2dc   :  { %v2385_v10 = vadd.f32 %v1227_v6, %v943_v3  ;;  %v1651_v3 = vrot.slane %v1633_v1, %v2601_v50 }
 0x2dd   :  { %v1230_v13 = vmax.f32 %v2384_v5, 0.0 }
 0x2de   :  { %v1231_v11 = vmax.f32 %v2385_v10, 0.0 }
 0x2e0   :  { %1335 = vmatprep.mubr.f32.mxu1 %v1231_v11 }
 0x2e1   :  { %1336 = vmatmul.mubr.f32.vlgmr.msra.gmra.mrb[6].mxu1 %v1230_v13  ;;  %v1681_v13 = vld [vmem:[#allocation2] ss:$0 sm:$0xff] }
 0x2e2   :  { %2350 = vmatpush3.bf16.msra.mxu1 %v2349_v12  ;;  %1763 = vmatprep.mubr.msk.f32.mxu1 %vm2459_vm0, %v2460_v22 }
 0x2e3   :  { %2351 = vmatprep.subr.bf16.mxu1 %v2458_v0 }
 0x2e6   :  { %2353 = vmatpush3.bf16.msra.mxu1 %v2352_v14  ;;  %v1635_v14 = vmul.f32 1.442695, %v1633_v1 }
 0x2e7   :  { %2354 = vmatprep.subr.bf16.mxu1 %v2458_v0 }
 0x2e8   :  { %2402 = vpow2.f32 %v1635_v14 }
 0x2ea   :  { %2356 = vmatpush3.bf16.msra.mxu1 %v2355_v18  ;;  %v1682_v18 = vld [vmem:[%s2870_s15] ss:$0 sm:$0xff] }
 0x2eb   :  { %2357 = vmatprep.subr.bf16.mxu1 %v2458_v0 }
 0x2ee   :  { %2359 = vmatpush3.bf16.msra.mxu1 %v2358_v21 }
 0x2ef   :  { %2360 = vmatprep.subr.bf16.mxu1 %v2458_v0 }
 0x2f2   :  { %v2403_v16 = vpop.eup %2402 }
 0x2f3   :  { %v1641_v17 = vrot.slane %v2403_v16, %v2601_v50 }
 0x3b4   :  { %v1717_v23 = vpop.f32.mrb[6].mxu1 }
 0x3b5   :  { %v1718_v25 = vpop.f32.mrb[7].mxu1 }
 0x3b6   :  { %v1719_v26 = vadd.f32 %v1718_v25, %v1717_v23 }
 0x3b8   :  { %v1338_v29 = vadd.f32 %v1719_v26, %v1675_v24 }
 0x3ba   :  { %v1341_v31 = vmax.f32 %v1338_v29, 0.0 }
 0x3bc   :  { %1764 = vmatmul.mubr.msk.f32.vlgmr.msra.gmra.mrb[8].mxu1 %vm1357_vm1, %v1341_v31 }
 0x3bd   :  { %2362 = vmatpush3.bf16.msra.mxu1 %v2361_v30  ;;  %1782 = vmatprep.mubr.msk.f32.mxu1 %vm2459_vm0, %v2460_v22 }
 0x3be   :  { %2363 = vmatprep.subr.bf16.mxu1 %v2458_v0 }
 0x3c1   :  { %2365 = vmatpush3.bf16.msra.mxu1 %v2364_v34 }
 0x3c2   :  { %2366 = vmatprep.subr.bf16.mxu1 %v2458_v0 }
 0x3c5   :  { %2368 = vmatpush3.bf16.msra.mxu1 %v2367_v37 }
 0x3c6   :  { %2369 = vmatprep.subr.bf16.mxu1 %v2458_v0 }
 0x3c9   :  { %2371 = vmatpush3.bf16.msra.mxu1 %v2370_v40 }
 0x3ca   :  { %2372 = vmatprep.subr.bf16.mxu1 %v2458_v0 }
 0x48f   :  { %v1427_v45 = vpop.f32.mrb[8].mxu1 }
 0x490   :  { %v1428_v46 = vadd.f32 %v1676_v41, %v1427_v45  ;;  %v1765_v47 = vpop.f32.mrb[9].mxu1 }
 0x492   :  { %v1431_v15 = vmax.f32 %v1428_v46, 0.0 }
 0x494   :  { %v1529_v56 = vmul.f32 %v1527_v48, %v1431_v15  ;;  %1783 = vmatmul.mubr.msk.f32.vlgmr.msra.gmra.mrb[10].mxu1 %vm1357_vm1, %v1431_v15 }
 0x495   :  { %2374 = vmatpush3.bf16.msra.mxu1 %v2373_v53  ;;  %1801 = vmatprep.mubr.msk.f32.mxu1 %vm2459_vm0, %v2460_v22 }
 0x496   :  { %1531 = vrot.lane.b32.xlu0 %v1529_v56, %s2454_s21  ;;  %2375 = vmatprep.subr.bf16.mxu1 %v2458_v0 }
 0x499   :  { %2377 = vmatpush3.bf16.msra.mxu1 %v2376_v57 }
 0x49a   :  { %2378 = vmatprep.subr.bf16.mxu1 %v2458_v0 }
 0x49d   :  { %2380 = vmatpush3.bf16.msra.mxu1 %v2379_v42 }
 0x49e   :  { %2381 = vmatprep.subr.bf16.mxu1 %v2458_v0  ;;  %v1634_v0 = vld [vmem:[%s2877_s29] sm:$0xff] }
 0x49f   :  { %v1645_v2 = vmul.f32 -0.5, %v1634_v0  ;;  %v1643_v19 = vmul.f32 %v1641_v17, %v1634_v0 }
 0x4a1   :  { %2383 = vmatpush3.bf16.msra.mxu1 %v2382_v60  ;;  %v1646_v4 = vmul.f32 %v1645_v2, %v1634_v0 }
 0x4a3   :  { %v1653_v5 = vsub.f32 %v1646_v4, %v1651_v3 }
 0x4a5   :  { %v1684_v6 = vadd.f32 -0.9189385, %v1653_v5 }
 0x4a7   :  { %v1656_v7 = vsel %vm1655_vm2, %v1684_v6, 0.0 }
 0x508   :  { %v1532_v61 = vpop.permute.xlu0 %1531 }
 0x509   :  { %v1534_v62 = vsel %vm1357_vm1, %v1532_v61, 0.0 }
 0x50a   :  { %1535 = vadd.xlane.f32.xlu1 %v1534_v62 }
 0x50e   :  { %1657 = vadd.xlane.f32.xlu1 %v1656_v7 }
 0x567   :  { %v1516_v10 = vpop.f32.mrb[10].mxu1 }
 0x568   :  { %v1517_v11 = vadd.f32 %v1678_v8, %v1516_v10  ;;  %v1784_v12 = vpop.f32.mrb[11].mxu1 }
 0x56a   :  { %1802 = vmatmul.mubr.msk.f32.vlgmr.msra.gmra.mrb[12].mxu1 %vm1357_vm1, %v1517_v11 }
 0x597   :  { %v1536_v49 = vpop.xlane.xlu1 %1535 }
 0x598   :  { %v1544_v52 = vadd.f32 %v1681_v13, %v1536_v49 }
 0x59a   :  { %1660 = vrot.lane.b32.xlu0 %v1544_v52, %s2461_s16 }
 0x59b   :  { %v1658_v23 = vpop.xlane.xlu1 %1657 }
 0x60c   :  { %v1661_v24 = vpop.permute.xlu0 %1660 }
 0x63d   :  { %v1629_v20 = vpop.f32.mrb[12].mxu1 }
 0x63e   :  { %v1630_v21 = vadd.f32 %v1682_v18, %v1629_v20  ;;  %v1803_v22 = vpop.f32.mrb[13].mxu1 }
 0x640   :  { %v1644_v63 = vadd.f32 %v1643_v19, %v1630_v21 }
 0x642   :  { %v1663_v25 = vsel %vm1655_vm2, %v1644_v63, %v1661_v24 }
 0x643   :  { %v1665_v26 = vsel %vm1664_vm3, %v1663_v25, %v1658_v23 }
 0x644   :  { %v1667_v27 = vsel %vm1666_vm4, %v1665_v26, 0.0 }
 0x645   :  { %1668 = vst [vmem:[%s2872_s17] sm:$0xff] %v1667_v27 }
 0x646   :  { %1673 = vsyncpa [#allocation4], 1 }
 0x647   :  { %1674 = vsyncpa [#allocation6], 1 }

</bundles_post_ra>
